<compile_context>
chip_gen: v6e
topology: v6e:2x2x1
jax: 0.10.0
libtpu: 0.0.40
codegen_flags: <defaults>
</compile_context>

<pallas_src>
import jax
import jax.numpy as jnp
import numpy as np
from jax.experimental import pallas as pl
from jax.experimental.pallas import tpu as pltpu

# ---- fixed module hyper-parameters (match the PyTorch __init__ defaults) ----
INPUT_DIM = 1
BASE_NEURONS = 20
NUM_SCALES = 3
ALPHA_BOUNDS = (1.0, 2.0)
X_MEAN = 0.5
X_STD = 0.5
# NOTE: self.scale_weights exists in the PyTorch module but is NOT used in forward(); omitted.
# TODO(synk): optional bf16 activations for v6e/v7x (2x EUP/VPU); kept f32 so one script is exact on v5e too.

CN = [BASE_NEURONS * (2 ** i) for i in range(NUM_SCALES)]       # [20, 40, 80]
BLK = [(c + 7) // 8 * 8 for c in CN]                            # [24, 40, 80]  (sublane padded)
OFF = [int(sum(BLK[:i])) for i in range(NUM_SCALES)]            # [0, 24, 64]
F_TOT = int(sum(BLK))                                           # 144
DEPTH = [i + 1 for i in range(NUM_SCALES)]                      # hidden layers per scale: 1,2,3
MAX_DEPTH = max(DEPTH)                                          # 3
MAX_TILE = 1024                                                 # points per grid step (on lanes)


# --------------------------------------------------------------------------------------
# Kernel
# --------------------------------------------------------------------------------------
def _multiscale_kernel(x_ref, whid_ref, cols_ref, wa_ref, tail_ref, out_ref):
    f = whid_ref.shape[1]
    t = x_ref.shape[2]

    x = x_ref[0]                                          # (1, T) lane-dense batch
    x_norm = (x - X_MEAN) / (X_STD + 1e-8)                # normalize_input

    # Fused input layer: per-scale Linear(1 -> cn) with the 2**i input scaling folded in.
    w_in = cols_ref[:, 0:1]                               # (F, 1)
    b_in = cols_ref[:, 1:2]                               # (F, 1)
    h = jnp.tanh(w_in * x_norm + b_in)                    # (F, T)

    row = jax.lax.broadcasted_iota(jnp.int32, (f, t), 0)

    # Fused block-diagonal hidden stack; finished scales pass through identity blocks (no tanh).
    for d in range(MAX_DEPTH):
        w = whid_ref[d]                                   # (F, F)
        bcol = cols_ref[:, 2 + d:3 + d]                   # (F, 1)
        z = jnp.dot(w, h, preferred_element_type=jnp.float32) + bcol
        td = jnp.tanh(z)
        if d == 0:
            h = td
        else:
            h = jnp.where(row >= OFF[d], td, z)           # rows < OFF[d] already finished

    # Per-scale readout Linears fused with combination Linear #1: (8, F) @ (F, T) (rows 3..7 = 0).
    pre = jnp.dot(wa_ref[...], h, preferred_element_type=jnp.float32)   # (8, T)

    # Tanh + final Linear(3 -> 1) unrolled as scalar-broadcast FMAs (scalars from SMEM).
    alpha_raw = None
    for j in range(NUM_SCALES):
        hc_j = jnp.tanh(pre[j:j + 1, :] + tail_ref[j])                  # + b_A[j]
        term = tail_ref[NUM_SCALES + j] * hc_j                          # * Wc2[j]
        alpha_raw = term if alpha_raw is None else alpha_raw + term
    alpha_raw = alpha_raw + tail_ref[2 * NUM_SCALES]                    # + bc2

    # apply_constraints, constraint_type == 'tanh'
    lo, hi = ALPHA_BOUNDS
    alpha = (hi - lo) * 0.5 * jnp.tanh(alpha_raw) + (hi + lo) * 0.5
    out_ref[0] = alpha.astype(out_ref.dtype)


# --------------------------------------------------------------------------------------
# Parameter construction & packing
# --------------------------------------------------------------------------------------
def _linear_dims():
    dims = []
    for i in range(NUM_SCALES):
        cn = CN[i]
        dims.append((INPUT_DIM, cn))
        dims += [(cn, cn)] * DEPTH[i]
        dims.append((cn, 1))
    dims.append((NUM_SCALES, NUM_SCALES))
    dims.append((NUM_SCALES, 1))
    return dims


def init_params(key):
    """Deterministic xavier-normal-ish weights + small random biases; (in, out) layout."""
    dims = _linear_dims()
    keys = jax.random.split(key, 2 * len(dims))
    params = []
    for n, (fan_in, fan_out) in enumerate(dims):
        std = float(np.sqrt(2.0 / (fan_in + fan_out)))
        w = jax.random.normal(keys[2 * n], (fan_in, fan_out), jnp.float32) * std
        b = jax.random.normal(keys[2 * n + 1], (fan_out,), jnp.float32) * 0.1
        params += [w, b]
    return params


def pack_params(raw_params):
    """Pack the 26 per-layer tensors into the fused kernel operands.

    Returns (whid, cols, w_a, tail):
      whid: (3, F, F) block-diagonal hidden weights; identity blocks for finished scales
      cols: (F, 5) columns = [w_in (2**i folded), b_in, b_hid0, b_hid1, b_hid2]
      w_a : (8, F)  rows 0..2 = Wc1^T @ W_readout (per-scale output fused with combination #1)
      tail: (8,)    SMEM scalars = [b_A(3), Wc2(3), bc2, 0]
    """
    p = [np.asarray(a, np.float32) for a in raw_params]
    idx = 0
    w_in = np.zeros((F_TOT,), np.float32)
    b_in = np.zeros((F_TOT,), np.float32)
    whid = np.zeros((MAX_DEPTH, F_TOT, F_TOT), np.float32)
    bhid = np.zeros((MAX_DEPTH, F_TOT), np.float32)
    w_read = np.zeros((NUM_SCALES, F_TOT), np.float32)
    b_read = np.zeros((NUM_SCALES,), np.float32)

    for i in range(NUM_SCALES):
        cn, blk, off = CN[i], BLK[i], OFF[i]
        w0, b0 = p[idx], p[idx + 1]; idx += 2
        w_in[off:off + cn] = w0[0, :] * (2.0 ** i)        # fold x_transformed = x_norm * 2**i
        b_in[off:off + cn] = b0
        for d in range(MAX_DEPTH):
            if d < DEPTH[i]:
                wd, bd = p[idx], p[idx + 1]; idx += 2
                whid[d, off:off + cn, off:off + cn] = wd.T      # kernel computes W @ h
                bhid[d, off:off + cn] = bd
            else:                                               # finished: exact passthrough
                whid[d, off:off + blk, off:off + blk] = np.eye(blk, dtype=np.float32)
        w_out, b_out = p[idx], p[idx + 1]; idx += 2
        w_read[i, off:off + cn] = w_out[:, 0]
        b_read[i] = b_out[0]

    wc1, bc1 = p[idx], p[idx + 1]; idx += 2
    wc2, bc2 = p[idx], p[idx + 1]; idx += 2

    w_a = np.zeros((8, F_TOT), np.float32)
    w_a[:NUM_SCALES] = wc1.T @ w_read                      # fold combination Linear #1
    b_a = wc1.T @ b_read + bc1
    tail = np.zeros((8,), np.float32)
    tail[0:NUM_SCALES] = b_a
    tail[NUM_SCALES:2 * NUM_SCALES] = wc2[:, 0]
    tail[2 * NUM_SCALES] = bc2[0]

    cols = np.stack([w_in, b_in, bhid[0], bhid[1], bhid[2]], axis=1)   # (F, 5)
    return (jnp.asarray(whid), jnp.asarray(cols), jnp.asarray(w_a), jnp.asarray(tail))


# --------------------------------------------------------------------------------------
# Wrapper
# --------------------------------------------------------------------------------------
def _round_up(n, m):
    return (n + m - 1) // m * m


def multiscale_order_forward(x, packed):
    """x: (N,) spatial coordinates -> alpha: (N, 1), matching the PyTorch forward."""
    whid, cols, w_a, tail = packed
    n = x.shape[0]
    tile = min(MAX_TILE, _round_up(max(n, 1), 128))
    n_pad = _round_up(n, tile)
    num_tiles = n_pad // tile

    xp = jnp.pad(x.astype(jnp.float32), (0, n_pad - n))
    x3 = xp.reshape(num_tiles, 1, tile)                    # lane-dense: points on lanes

    out = pl.pallas_call(
        _multiscale_kernel,
        out_shape=jax.ShapeDtypeStruct((num_tiles, 1, tile), jnp.float32),
        grid=(num_tiles,),
        in_specs=[
            pl.BlockSpec((1, 1, tile), lambda i: (i, 0, 0)),                  # x tile (pipelined)
            pl.BlockSpec((MAX_DEPTH, F_TOT, F_TOT), lambda i: (0, 0, 0)),     # resident weights
            pl.BlockSpec((F_TOT, 5), lambda i: (0, 0)),                       # resident columns
            pl.BlockSpec((8, F_TOT), lambda i: (0, 0)),                       # resident readout
            pl.BlockSpec(memory_space=pltpu.MemorySpace.SMEM),                # scalar tail
        ],
        out_specs=pl.BlockSpec((1, 1, tile), lambda i: (i, 0, 0)),
        compiler_params=pltpu.CompilerParams(
            dimension_semantics=("parallel",),             # megacore sharding on v7x
        ),
    )(x3, whid, cols, w_a, tail)

    return out.reshape(n_pad, 1)[:n]


# --------------------------------------------------------------------------------------
# Pure-JAX reference (mirrors the PyTorch module, unfused) for the correctness check
# --------------------------------------------------------------------------------------
def _reference_forward(x, raw_params):
    lo, hi = ALPHA_BOUNDS
    xn = ((x.astype(jnp.float32) - X_MEAN) / (X_STD + 1e-8)).reshape(-1, 1)
    idx = 0
    outs = []
    for i in range(NUM_SCALES):
        h = xn * (2.0 ** i)
        n_lin = 3 + i
        for li in range(n_lin):
            w, b = raw_params[idx], raw_params[idx + 1]
            idx += 2
            h = jnp.dot(h, w) + b
            if li < n_lin - 1:
                h = jnp.tanh(h)
        outs.append(h)
    combined = jnp.concatenate(outs, axis=-1)
    h = jnp.tanh(jnp.dot(combined, raw_params[idx]) + raw_params[idx + 1])
    alpha_raw = jnp.dot(h, raw_params[idx + 2]) + raw_params[idx + 3]
    return (hi - lo) / 2.0 * jnp.tanh(alpha_raw) + (hi + lo) / 2.0


if __name__ == "__main__":
    key = jax.random.PRNGKey(0)
    k_param, k_x = jax.random.split(key)
    raw_params = init_params(k_param)
    packed = pack_params(raw_params)

    # small batch of spatial coordinates in [0, 1]; non-multiple of 128 to exercise padding
    n = 200
    x = jax.random.uniform(k_x, (n,), dtype=jnp.float32)

    alpha = multiscale_order_forward(x, packed)
    alpha = jax.block_until_ready(alpha)

    alpha_ref = _reference_forward(x, raw_params)
    np.testing.assert_allclose(np.asarray(alpha), np.asarray(alpha_ref), rtol=1e-4, atol=1e-4)
    assert alpha.shape == (n, 1)
    assert float(jnp.min(alpha)) >= ALPHA_BOUNDS[0] and float(jnp.max(alpha)) <= ALPHA_BOUNDS[1]

    print("KERNEL_OK")
</pallas_src>

<mosaic_0001>
module attributes {stable_mosaic.version = 11 : i64} {
  func.func @_multiscale_kernel(%arg0: i32, %arg1: memref<1x1x256xf32, #tpu.memory_space<vmem>>, %arg2: memref<3x144x144xf32, #tpu.memory_space<vmem>>, %arg3: memref<144x5xf32, #tpu.memory_space<vmem>>, %arg4: memref<8x144xf32, #tpu.memory_space<vmem>>, %arg5: memref<8xf32, #tpu.memory_space<smem>>, %arg6: memref<1x1x256xf32, #tpu.memory_space<vmem>>) attributes {dimension_semantics = [#tpu.dimension_semantics<parallel>], iteration_bounds = array<i64: 1>, scalar_prefetch = 0 : i64, scratch_operands = 0 : i64, tpu.core_type = #tpu.core_type<tc>, window_params = [{transform_indices = @transform_0, window_bounds = array<i64: 1, 1, 256>}, {pipeline_mode = #tpu.pipeline_mode<synchronous>, transform_indices = @transform_1, window_bounds = array<i64: 3, 144, 144>}, {pipeline_mode = #tpu.pipeline_mode<synchronous>, transform_indices = @transform_2, window_bounds = array<i64: 144, 5>}, {pipeline_mode = #tpu.pipeline_mode<synchronous>, transform_indices = @transform_3, window_bounds = array<i64: 8, 144>}, {transform_indices = @transform_4, window_bounds = array<i64: 8>}, {transform_indices = @transform_5, window_bounds = array<i64: 1, 1, 256>}]} {
    %c0 = arith.constant 0 : index
    %c0_0 = arith.constant 0 : index
    %c0_1 = arith.constant 0 : index
    %0 = vector.load %arg1[%c0, %c0_0, %c0_1] : memref<1x1x256xf32, #tpu.memory_space<vmem>>, vector<1x1x256xf32>
    %1 = vector.shape_cast %0 : vector<1x1x256xf32> to vector<1x256xf32>
    %cst = arith.constant 5.000000e-01 : f32
    %2 = vector.broadcast %cst : f32 to vector<1x256xf32>
    %3 = arith.subf %1, %2 : vector<1x256xf32>
    %cst_2 = arith.constant 5.000000e-01 : f32
    %4 = vector.broadcast %cst_2 : f32 to vector<1x256xf32>
    %5 = arith.divf %3, %4 : vector<1x256xf32>
    %c0_3 = arith.constant 0 : index
    %c0_4 = arith.constant 0 : index
    %6 = vector.load %arg3[%c0_3, %c0_4] : memref<144x5xf32, #tpu.memory_space<vmem>>, vector<144x1xf32>
    %c0_5 = arith.constant 0 : index
    %c1 = arith.constant 1 : index
    %7 = vector.load %arg3[%c0_5, %c1] : memref<144x5xf32, #tpu.memory_space<vmem>>, vector<144x1xf32>
    %8 = vector.broadcast %6 : vector<144x1xf32> to vector<144x256xf32>
    %9 = vector.broadcast %5 : vector<1x256xf32> to vector<144x256xf32>
    %10 = arith.mulf %8, %9 : vector<144x256xf32>
    %11 = vector.broadcast %7 : vector<144x1xf32> to vector<144x256xf32>
    %12 = arith.addf %10, %11 : vector<144x256xf32>
    %13 = math.tanh %12 : vector<144x256xf32>
    %14 = tpu.iota {dimensions = array<i32: 0>} : vector<144x256xi32>
    %c0_6 = arith.constant 0 : index
    %c0_7 = arith.constant 0 : index
    %c0_8 = arith.constant 0 : index
    %15 = vector.load %arg2[%c0_6, %c0_7, %c0_8] : memref<3x144x144xf32, #tpu.memory_space<vmem>>, vector<1x144x144xf32>
    %16 = vector.shape_cast %15 : vector<1x144x144xf32> to vector<144x144xf32>
    %c0_9 = arith.constant 0 : index
    %c2 = arith.constant 2 : index
    %17 = vector.load %arg3[%c0_9, %c2] : memref<144x5xf32, #tpu.memory_space<vmem>>, vector<144x1xf32>
    %cst_10 = arith.constant dense<0.000000e+00> : vector<144x256xf32>
    %18 = tpu.matmul %16, %13, %cst_10 {dimension_numbers = #tpu.dot_dimension_numbers<[1], [0], [0], [1], [0, 0, 1, 1], [], []>} : vector<144x144xf32>, vector<144x256xf32>, vector<144x256xf32> -> vector<144x256xf32>
    %19 = vector.broadcast %17 : vector<144x1xf32> to vector<144x256xf32>
    %20 = arith.addf %18, %19 : vector<144x256xf32>
    %21 = math.tanh %20 : vector<144x256xf32>
    %c1_11 = arith.constant 1 : index
    %c0_12 = arith.constant 0 : index
    %c0_13 = arith.constant 0 : index
    %22 = vector.load %arg2[%c1_11, %c0_12, %c0_13] : memref<3x144x144xf32, #tpu.memory_space<vmem>>, vector<1x144x144xf32>
    %23 = vector.shape_cast %22 : vector<1x144x144xf32> to vector<144x144xf32>
    %c0_14 = arith.constant 0 : index
    %c3 = arith.constant 3 : index
    %24 = vector.load %arg3[%c0_14, %c3] : memref<144x5xf32, #tpu.memory_space<vmem>>, vector<144x1xf32>
    %cst_15 = arith.constant dense<0.000000e+00> : vector<144x256xf32>
    %25 = tpu.matmul %23, %21, %cst_15 {dimension_numbers = #tpu.dot_dimension_numbers<[1], [0], [0], [1], [0, 0, 1, 1], [], []>} : vector<144x144xf32>, vector<144x256xf32>, vector<144x256xf32> -> vector<144x256xf32>
    %26 = vector.broadcast %24 : vector<144x1xf32> to vector<144x256xf32>
    %27 = arith.addf %25, %26 : vector<144x256xf32>
    %28 = math.tanh %27 : vector<144x256xf32>
    %c24_i32 = arith.constant 24 : i32
    %29 = vector.broadcast %c24_i32 : i32 to vector<144x256xi32>
    %30 = arith.cmpi sge, %14, %29 : vector<144x256xi32>
    %31 = arith.select %30, %28, %27 : vector<144x256xi1>, vector<144x256xf32>
    %c2_16 = arith.constant 2 : index
    %c0_17 = arith.constant 0 : index
    %c0_18 = arith.constant 0 : index
    %32 = vector.load %arg2[%c2_16, %c0_17, %c0_18] : memref<3x144x144xf32, #tpu.memory_space<vmem>>, vector<1x144x144xf32>
    %33 = vector.shape_cast %32 : vector<1x144x144xf32> to vector<144x144xf32>
    %c0_19 = arith.constant 0 : index
    %c4 = arith.constant 4 : index
    %34 = vector.load %arg3[%c0_19, %c4] : memref<144x5xf32, #tpu.memory_space<vmem>>, vector<144x1xf32>
    %cst_20 = arith.constant dense<0.000000e+00> : vector<144x256xf32>
    %35 = tpu.matmul %33, %31, %cst_20 {dimension_numbers = #tpu.dot_dimension_numbers<[1], [0], [0], [1], [0, 0, 1, 1], [], []>} : vector<144x144xf32>, vector<144x256xf32>, vector<144x256xf32> -> vector<144x256xf32>
    %36 = vector.broadcast %34 : vector<144x1xf32> to vector<144x256xf32>
    %37 = arith.addf %35, %36 : vector<144x256xf32>
    %38 = math.tanh %37 : vector<144x256xf32>
    %c64_i32 = arith.constant 64 : i32
    %39 = vector.broadcast %c64_i32 : i32 to vector<144x256xi32>
    %40 = arith.cmpi sge, %14, %39 : vector<144x256xi32>
    %41 = arith.select %40, %38, %37 : vector<144x256xi1>, vector<144x256xf32>
    %c0_21 = arith.constant 0 : index
    %c0_22 = arith.constant 0 : index
    %42 = vector.load %arg4[%c0_21, %c0_22] : memref<8x144xf32, #tpu.memory_space<vmem>>, vector<8x144xf32>
    %cst_23 = arith.constant dense<0.000000e+00> : vector<8x256xf32>
    %43 = tpu.matmul %42, %41, %cst_23 {dimension_numbers = #tpu.dot_dimension_numbers<[1], [0], [0], [1], [0, 0, 1, 1], [], []>} : vector<8x144xf32>, vector<144x256xf32>, vector<8x256xf32> -> vector<8x256xf32>
    %44 = vector.extract_strided_slice %43 {offsets = [0, 0], sizes = [1, 256], strides = [1, 1]} : vector<8x256xf32> to vector<1x256xf32>
    %c0_24 = arith.constant 0 : index
    %45 = memref.load %arg5[%c0_24] : memref<8xf32, #tpu.memory_space<smem>>
    %46 = vector.broadcast %45 : f32 to vector<1x256xf32>
    %47 = arith.addf %44, %46 : vector<1x256xf32>
    %48 = math.tanh %47 : vector<1x256xf32>
    %c3_25 = arith.constant 3 : index
    %49 = memref.load %arg5[%c3_25] : memref<8xf32, #tpu.memory_space<smem>>
    %50 = vector.broadcast %49 : f32 to vector<1x256xf32>
    %51 = arith.mulf %50, %48 : vector<1x256xf32>
    %52 = vector.extract_strided_slice %43 {offsets = [1, 0], sizes = [1, 256], strides = [1, 1]} : vector<8x256xf32> to vector<1x256xf32>
    %c1_26 = arith.constant 1 : index
    %53 = memref.load %arg5[%c1_26] : memref<8xf32, #tpu.memory_space<smem>>
    %54 = vector.broadcast %53 : f32 to vector<1x256xf32>
    %55 = arith.addf %52, %54 : vector<1x256xf32>
    %56 = math.tanh %55 : vector<1x256xf32>
    %c4_27 = arith.constant 4 : index
    %57 = memref.load %arg5[%c4_27] : memref<8xf32, #tpu.memory_space<smem>>
    %58 = vector.broadcast %57 : f32 to vector<1x256xf32>
    %59 = arith.mulf %58, %56 : vector<1x256xf32>
    %60 = arith.addf %51, %59 : vector<1x256xf32>
    %61 = vector.extract_strided_slice %43 {offsets = [2, 0], sizes = [1, 256], strides = [1, 1]} : vector<8x256xf32> to vector<1x256xf32>
    %c2_28 = arith.constant 2 : index
    %62 = memref.load %arg5[%c2_28] : memref<8xf32, #tpu.memory_space<smem>>
    %63 = vector.broadcast %62 : f32 to vector<1x256xf32>
    %64 = arith.addf %61, %63 : vector<1x256xf32>
    %65 = math.tanh %64 : vector<1x256xf32>
    %c5 = arith.constant 5 : index
    %66 = memref.load %arg5[%c5] : memref<8xf32, #tpu.memory_space<smem>>
    %67 = vector.broadcast %66 : f32 to vector<1x256xf32>
    %68 = arith.mulf %67, %65 : vector<1x256xf32>
    %69 = arith.addf %60, %68 : vector<1x256xf32>
    %c6 = arith.constant 6 : index
    %70 = memref.load %arg5[%c6] : memref<8xf32, #tpu.memory_space<smem>>
    %71 = vector.broadcast %70 : f32 to vector<1x256xf32>
    %72 = arith.addf %69, %71 : vector<1x256xf32>
    %73 = math.tanh %72 : vector<1x256xf32>
    %cst_29 = arith.constant 5.000000e-01 : f32
    %74 = vector.broadcast %cst_29 : f32 to vector<1x256xf32>
    %75 = arith.mulf %74, %73 : vector<1x256xf32>
    %cst_30 = arith.constant 1.500000e+00 : f32
    %76 = vector.broadcast %cst_30 : f32 to vector<1x256xf32>
    %77 = arith.addf %75, %76 : vector<1x256xf32>
    %c0_31 = arith.constant 0 : index
    %c0_32 = arith.constant 0 : index
    %c0_33 = arith.constant 0 : index
    %78 = vector.load %arg6[%c0_31, %c0_32, %c0_33] : memref<1x1x256xf32, #tpu.memory_space<vmem>>, vector<1x1x256xf32>
    %79 = vector.shape_cast %78 : vector<1x1x256xf32> to vector<1x256xf32>
    %80 = vector.shape_cast %77 : vector<1x256xf32> to vector<1x1x256xf32>
    tpu.vector_store %arg6[%c0_31, %c0_32, %c0_33], %80 {strides = array<i32>} : memref<1x1x256xf32, #tpu.memory_space<vmem>>, vector<1x1x256xf32>,
    return
  }
  func.func @transform_0(%arg0: i32) -> (i32, i32, i32) {
    %c0_i32 = arith.constant 0 : i32
    %c0_i32_0 = arith.constant 0 : i32
    %c0_i32_1 = arith.constant 0 : i32
    return %arg0, %c0_i32, %c0_i32_0 : i32, i32, i32
  }
  func.func @transform_1(%arg0: i32) -> (i32, i32, i32) {
    %c0_i32 = arith.constant 0 : i32
    %c0_i32_0 = arith.constant 0 : i32
    %c0_i32_1 = arith.constant 0 : i32
    %c0_i32_2 = arith.constant 0 : i32
    return %c0_i32, %c0_i32_0, %c0_i32_1 : i32, i32, i32
  }
  func.func @transform_2(%arg0: i32) -> (i32, i32) {
    %c0_i32 = arith.constant 0 : i32
    %c0_i32_0 = arith.constant 0 : i32
    %c0_i32_1 = arith.constant 0 : i32
    return %c0_i32, %c0_i32_0 : i32, i32
  }
  func.func @transform_3(%arg0: i32) -> (i32, i32) {
    %c0_i32 = arith.constant 0 : i32
    %c0_i32_0 = arith.constant 0 : i32
    %c0_i32_1 = arith.constant 0 : i32
    return %c0_i32, %c0_i32_0 : i32, i32
  }
  func.func @transform_4(%arg0: i32) -> i32 {
    %c0_i32 = arith.constant 0 : i32
    %c0_i32_0 = arith.constant 0 : i32
    return %c0_i32 : i32
  }
  func.func @transform_5(%arg0: i32) -> (i32, i32, i32) {
    %c0_i32 = arith.constant 0 : i32
    %c0_i32_0 = arith.constant 0 : i32
    %c0_i32_1 = arith.constant 0 : i32
    return %arg0, %c0_i32, %c0_i32_0 : i32, i32, i32
  }
}

</mosaic_0001>

<bundles_post_ra>
// kernel: tpu_custom_call.1
= control target key start
LH: loop header
LB: loop body
LE: loop exit
PB: predicated region body
PF: predicated region fallthrough
CT: control target
= control target key end

     0   :  { %10 = vsyncpa [#allocation3], 0  ;;  %s2782_s0 = inlined_call_operand.vmem [shape: f32[1,1,256], index: 0, kind: input, shape index: {}]   ;;  %s2783_s1 = inlined_call_operand.hbm [shape: f32[3,144,144], index: 1, kind: input, shape index: {}]   ;;  %s2784_s2 = inlined_call_operand.vmem [shape: f32[144,5], index: 2, kind: input, shape index: {}]   ;;  %s2785_s3 = inlined_call_operand.vmem [shape: f32[8,144], index: 3, kind: input, shape index: {}]   ;;  %s2786_s4 = inlined_call_operand.vmem [shape: f32[8], index: 4, kind: input, shape index: {}]   ;;  %s2787_s5 = inlined_call_operand.hbm [shape: f32[1,1,256], index: 5, kind: output, shape index: {}]  }
   0x1   :  { %11 = vsyncpa [#allocation5], 0 }
   0x2   :  { %12 = vsyncpa [#allocation4], 0  ;;  %s2233_s18 = smov [#allocation2]   ;;  %s37_s22 = sshll.u32 %s2786_s4, 4  ;;  %s38_s22 = int_to_ptr.vmem [resolvable:$true] %s37_s22 }
   0x3   :  { %s20_s19 = sshll.u32 %s2233_s18, 4  ;;  %s21_s19 = int_to_ptr.vmem [resolvable:$true] %s20_s19 }
   0x4   :  { %s2183_s23 = scalar_lea.vmem %s21_s19, 13824  ;;  %p2188_p1 = scmp.lt.s32.totalorder %s21_s19, %s21_s19 }
   0x5   :  { %p2184_p0 = scmp.ne.s32.totalorder %s21_s19, %s2183_s23  ;;  %p2189_p2 = scmp.lt.s32.totalorder %s2183_s23, %s2183_s23 }
   0x7   :  { %p2190_p3 = por %p2189_p2, %p2188_p1 }
   0x9   :  { %p2191_p4 = pnand %p2190_p3, %p2184_p0 }
   0xb   :  { %2194 = shalt.err (!%p2191_p4)
}
   0xc   :  { %s2234_s24 = smov 256   ;;  %s2235_s25 = smov 16  }
   0xd   :  { %26 = dma.hbm_to_vmem [thread:$0]  %s2783_s1, 13824, %s21_s19, [#allocation3], %s2234_s24, %s2234_s24, %s2235_s25  }
   0xe   :  { %s2195_s28 = scalar_lea.vmem %s38_s22, 16  ;;  %p2200_p6 = scmp.lt.s32.totalorder %s38_s22, %s38_s22 }
   0xf   :  { %p2196_p5 = scmp.ne.s32.totalorder %s38_s22, %s2195_s28  ;;  %p2201_p7 = scmp.lt.s32.totalorder %s2195_s28, %s2195_s28 }
  0x11   :  { %p2202_p8 = por %p2201_p7, %p2200_p6 }
  0x13   :  { %p2203_p9 = pnand %p2202_p8, %p2196_p5 }
  0x15   :  { %2206 = shalt.err (!%p2203_p9)
}
  0x16   :  { %s2236_s4 = smov [#allocation6]  }
  0x17   :  { %40 = dma.vmem_to_smem %s38_s22, 16, %s2236_s4, [#allocation5]  }
  0x18   :  { %2227 = dma.done.wait [#allocation3], 13824  }
  0x19   :  { %2228 = vsyncadd [#allocation3], 4294953472 }
  0x1a   :  { %2229 = dma.done.wait [#allocation5], 16  }
  0x1b   :  { %2230 = vsyncadd [#allocation5], 4294967280 }
  0x1c   :  { %47 = sfence }
  0x1d   :  { %v2283_v0 = vld [vmem:[%s2784_s2 + $0x78] sm:$0xff]  ;;  %v2237_v1 = vmov 1   ;;  %v2238_v2 = vmov 0   ;;  %v2292_v3 = vld [vmem:[%s2784_s2 + $0x70] sm:$0xff]  ;;  %v2297_v4 = vld [vmem:[%s2784_s2 + $0x68] sm:$0xff]  ;;  %v161_v20 = vlaneseq  ;;  %vm478_vm0 = vcmask 130048  }
  0x1e   :  { %1875 = vset.pattern.permute.xlu1 %v2237_v1  ;;  %1874 = vset.pattern.permute.xlu0 %v2238_v2  ;;  %v2305_v5 = vld [vmem:[%s2784_s2 + $0x58] sm:$0xff]  ;;  %v2310_v6 = vld [vmem:[%s2784_s2 + $0x60] sm:$0xff]  ;;  %v2328_v8 = vld [vmem:[%s2784_s2 + $0x50] sm:$0xff]  ;;  %s1670_s24 = sld [smem:[#allocation6]]  ;;  %s2243_s29 = smov [#allocation7]  }
  0x1f   :  { %268 = vperm.xlu1 %1875, %v2283_v0   ;;  %147 = vperm.xlu0 %1874, %v2283_v0   ;;  %v2323_v7 = vld [vmem:[%s2784_s2 + $0x40] sm:$0xff]  ;;  %v2335_v9 = vld [vmem:[%s2784_s2 + $0x28] sm:$0xff]  ;;  %v2347_v11 = vld [vmem:[%s2784_s2 + $0x10] sm:$0xff]  ;;  %v2427_v22 = vshrl.u32 %v161_v20, 7  ;;  %s1822_s25 = sld [smem:[#allocation6 + $0x1]]  ;;  %s1755_s30 = sshll.u32 %s2243_s29, 4  ;;  %s1756_s30 = int_to_ptr.vmem [resolvable:$true] %s1755_s30 }
  0x20   :  { %v2341_v10 = vld [vmem:[%s2784_s2 + $0x48] sm:$0xff]  ;;  %v2359_v12 = vld [vmem:[%s2784_s2 + $0x38] sm:$0xff]  ;;  %v2367_v13 = vld [vmem:[%s2784_s2 + $0x30] sm:$0xff]  ;;  %s1824_s26 = sld [smem:[#allocation6 + $0x2]]  ;;  %vm1746_vm1 = vcmp.lt.s32.totalorder %v161_v20, 256  ;;  %s2207_s1 = scalar_lea.vmem %s1756_s30, 32 }
  0x21   :  { %v2373_v14 = vld [vmem:[%s2784_s2 + $0x88] sm:$0xff]  ;;  %v2385_v15 = vld [vmem:[%s2784_s2 + $0x20] sm:$0xff]  ;;  %v2392_v16 = vld [vmem:[%s2784_s2 + $0x18] sm:$0xff]  ;;  %v163_v26 = vsub.s32 0, %v2427_v22  ;;  %v167_v27 = vsub.s32 1, %v2427_v22  ;;  %s1821_s27 = sld [smem:[#allocation6 + $0x3]]  ;;  %p2208_p10 = scmp.ne.s32.totalorder %s1756_s30, %s2207_s1 }
  0x22   :  { %v2401_v17 = vld [vmem:[%s2784_s2 + $0x8] sm:$0xff]  ;;  %v2408_v18 = vld [vmem:[%s2784_s2] sm:$0xff]  ;;  %v389_v25 = vld [vmem:[#allocation2 + $0x98] sm:$0xff]  ;;  %s1825_s28 = sld [smem:[#allocation6 + $0x5]]  ;;  %p2212_p11 = scmp.lt.s32.totalorder %s1756_s30, %s1756_s30 }
  0x23   :  { %1876 = vset.pattern.permute.xlu1 %v2238_v2  ;;  %142 = vperm.xlu0 %1874, %v2292_v3   ;;  %v2417_v19 = vld [vmem:[%s2784_s2 + $0x80] sm:$0xff]  ;;  %v371_v24 = vld [vmem:[#allocation2 + $0x8] sm:$0xff]  ;;  %s1826_s4 = sld [smem:[#allocation6 + $0x6]]  ;;  %p2213_p12 = scmp.lt.s32.totalorder %s2207_s1, %s2207_s1 }
  0x24   :  { %137 = vperm.xlu1 %1876, %v2297_v4   ;;  %v48_v21 = vld [vmem:[%s2782_s0] sm:$0x3]  ;;  %1766 = vmatprep.mubr.msk.f32.mxu0 %vm478_vm0, %v371_v24 }
  0x25   :  { %v1765_v23 = vadd.f32 -0.5, %v48_v21  ;;  %1775 = vmatprep.mubr.msk.f32.mxu1 %vm478_vm0, %v389_v25  ;;  %v2239_v21 = vmov 2   ;;  %p2214_p13 = por %p2213_p12, %p2212_p11 }
  0x27   :  { %127 = vperm.xlu0 %1874, %v2305_v5   ;;  %v51_v28 = vmul.f32 2.0, %v1765_v23  ;;  %p2215_p0 = pnand %p2214_p13, %p2208_p10 }
  0x28   :  { %132 = vperm.xlu1 %1876, %v2310_v6  }
  0x29   :  { %v2433_v29 = vrot.slane %v51_v28, %v163_v26  ;;  %v2435_v30 = vrot.slane %v51_v28, %v167_v27 }
  0x2b   :  { %1878 = vset.pattern.permute.xlu0 %v2237_v1 }
  0x2c   :  { %1877 = vset.pattern.permute.xlu1 %v2237_v1  ;;  %264 = vperm.xlu0 %1878, %v2292_v3  }
  0x2d   :  { %260 = vperm.xlu1 %1877, %v2297_v4  }
  0x30   :  { %252 = vperm.xlu0 %1878, %v2305_v5  }
  0x31   :  { %256 = vperm.xlu1 %1877, %v2310_v6  }
  0x34   :  { %240 = vperm.xlu0 %1878, %v2323_v7  }
  0x35   :  { %1879 = vset.pattern.permute.xlu1 %v2238_v2 }
  0x36   :  { %122 = vperm.xlu1 %1879, %v2328_v8  }
  0x38   :  { %228 = vperm.xlu0 %1878, %v2335_v9  }
  0x3a   :  { %117 = vperm.xlu1 %1879, %v2341_v10  }
  0x3c   :  { %216 = vperm.xlu0 %1878, %v2347_v11  }
  0x3e   :  { %1880 = vset.pattern.permute.xlu1 %v2237_v1 }
  0x3f   :  { %248 = vperm.xlu1 %1880, %v2328_v8  }
  0x40   :  { %1886 = vset.pattern.permute.xlu0 %v2238_v2 }
  0x41   :  { %112 = vperm.xlu0 %1886, %v2323_v7  }
  0x43   :  { %244 = vperm.xlu1 %1880, %v2341_v10  }
  0x45   :  { %97 = vperm.xlu0 %1886, %v2335_v9  }
  0x47   :  { %1881 = vset.pattern.permute.xlu1 %v2238_v2 }
  0x48   :  { %107 = vperm.xlu1 %1881, %v2359_v12  }
  0x49   :  { %82 = vperm.xlu0 %1886, %v2347_v11  }
  0x4c   :  { %102 = vperm.xlu1 %1881, %v2367_v13  }
  0x4d   :  { %157 = vperm.xlu0 %1886, %v2373_v14  }
  0x50   :  { %1882 = vset.pattern.permute.xlu1 %v2237_v1 }
  0x51   :  { %236 = vperm.xlu1 %1882, %v2359_v12   ;;  %1889 = vset.pattern.permute.xlu0 %v2237_v1 }
  0x52   :  { %276 = vperm.xlu0 %1889, %v2373_v14  }
  0x55   :  { %232 = vperm.xlu1 %1882, %v2367_v13  }
  0x56   :  { %1892 = vset.pattern.permute.xlu0 %v2239_v21 }
  0x57   :  { %463 = vperm.xlu0 %1892, %v2292_v3  }
  0x59   :  { %1883 = vset.pattern.permute.xlu1 %v2238_v2 }
  0x5a   :  { %92 = vperm.xlu1 %1883, %v2385_v15  }
  0x5b   :  { %451 = vperm.xlu0 %1892, %v2305_v5  }
  0x5e   :  { %87 = vperm.xlu1 %1883, %v2392_v16  }
  0x5f   :  { %443 = vperm.xlu0 %1892, %v2341_v10  }
  0x62   :  { %1884 = vset.pattern.permute.xlu1 %v2237_v1 }
  0x63   :  { %224 = vperm.xlu1 %1884, %v2385_v15   ;;  %435 = vperm.xlu0 %1892, %v2359_v12  }
  0x67   :  { %220 = vperm.xlu1 %1884, %v2392_v16   ;;  %427 = vperm.xlu0 %1892, %v2335_v9  }
  0x6b   :  { %1885 = vset.pattern.permute.xlu1 %v2238_v2  ;;  %419 = vperm.xlu0 %1892, %v2392_v16  }
  0x6c   :  { %77 = vperm.xlu1 %1885, %v2401_v17  }
  0x6f   :  { %411 = vperm.xlu0 %1892, %v2401_v17  }
  0x70   :  { %72 = vperm.xlu1 %1885, %v2408_v18  }
  0x73   :  { %475 = vperm.xlu0 %1892, %v2373_v14  }
  0x74   :  { %1887 = vset.pattern.permute.xlu1 %v2237_v1 }
  0x75   :  { %212 = vperm.xlu1 %1887, %v2401_v17  }
  0x79   :  { %208 = vperm.xlu1 %1887, %v2408_v18  }
  0x7d   :  { %1888 = vset.pattern.permute.xlu1 %v2238_v2 }
  0x7e   :  { %152 = vperm.xlu1 %1888, %v2417_v19  }
  0x82   :  { %1890 = vset.pattern.permute.xlu1 %v2237_v1 }
  0x83   :  { %272 = vperm.xlu1 %1890, %v2417_v19  }
  0x87   :  { %1891 = vset.pattern.permute.xlu1 %v2239_v21 }
  0x88   :  { %467 = vperm.xlu1 %1891, %v2283_v0  }
  0x8c   :  { %459 = vperm.xlu1 %1891, %v2297_v4  }
  0x90   :  { %455 = vperm.xlu1 %1891, %v2310_v6  }
  0x94   :  { %447 = vperm.xlu1 %1891, %v2328_v8  }
  0x98   :  { %439 = vperm.xlu1 %1891, %v2323_v7  }
  0x9a   :  { %v269_v31 = vpop.permute.xlu1 %268  ;;  %v148_v32 = vpop.permute.xlu0 %147 }
  0x9b   :  { %v201_v33 = vmul.f32 %v2433_v29, %v148_v32  ;;  %v202_v34 = vmul.f32 %v2435_v30, %v148_v32 }
  0x9c   :  { %431 = vperm.xlu1 %1891, %v2367_v13  }
  0x9d   :  { %v309_v35 = vadd.f32 %v269_v31, %v201_v33  ;;  %v310_v36 = vadd.f32 %v269_v31, %v202_v34 }
  0x9e   :  { %v143_v37 = vpop.permute.xlu0 %142 }
  0x9f   :  { %1897 = vtanh.f32 %v309_v35  ;;  %v138_v38 = vpop.permute.xlu1 %137  ;;  %v199_v41 = vmul.f32 %v2433_v29, %v143_v37  ;;  %v200_v42 = vmul.f32 %v2435_v30, %v143_v37 }
  0xa0   :  { %1899 = vtanh.f32 %v310_v36  ;;  %v197_v43 = vmul.f32 %v2433_v29, %v138_v38  ;;  %v198_v44 = vmul.f32 %v2435_v30, %v138_v38  ;;  %423 = vperm.xlu1 %1891, %v2385_v15  }
  0xa2   :  { %v128_v39 = vpop.permute.xlu0 %127 }
  0xa3   :  { %v133_v40 = vpop.permute.xlu1 %132  ;;  %v193_v46 = vmul.f32 %v2433_v29, %v128_v39  ;;  %v194_v50 = vmul.f32 %v2435_v30, %v128_v39 }
  0xa4   :  { %v195_v53 = vmul.f32 %v2433_v29, %v133_v40  ;;  %v196_v54 = vmul.f32 %v2435_v30, %v133_v40  ;;  %415 = vperm.xlu1 %1891, %v2347_v11  }
  0xa7   :  { %v265_v45 = vpop.permute.xlu0 %264 }
  0xa8   :  { %v307_v47 = vadd.f32 %v265_v45, %v199_v41  ;;  %v308_v48 = vadd.f32 %v265_v45, %v200_v42  ;;  %v261_v49 = vpop.permute.xlu1 %260  ;;  %407 = vperm.xlu1 %1891, %v2408_v18  }
  0xa9   :  { %v305_v51 = vadd.f32 %v261_v49, %v197_v43  ;;  %v306_v52 = vadd.f32 %v261_v49, %v198_v44 }
  0xaa   :  { %1901 = vtanh.f32 %v307_v47 }
  0xab   :  { %1903 = vtanh.f32 %v308_v48  ;;  %v253_v55 = vpop.permute.xlu0 %252 }
  0xac   :  { %v1898_v56 = vpop.eup %1897  ;;  %1905 = vtanh.f32 %v305_v51  ;;  %v257_v57 = vpop.permute.xlu1 %256  ;;  %v301_v58 = vadd.f32 %v253_v55, %v193_v46  ;;  %v302_v62 = vadd.f32 %v253_v55, %v194_v50  ;;  %471 = vperm.xlu1 %1891, %v2417_v19  }
  0xad   :  { %v1900_v59 = vpop.eup %1899  ;;  %1907 = vtanh.f32 %v306_v52  ;;  %v303_v60 = vadd.f32 %v257_v57, %v195_v53  ;;  %v304_v61 = vadd.f32 %v257_v57, %v196_v54 }
  0xae   :  { %533 = vmatprep.subr.mxu0 %v1900_v59  ;;  %1827 = vmatprep.subr.mxu1 %v1900_v59  ;;  %1909 = vtanh.f32 %v301_v58 }
  0xaf   :  { %1911 = vtanh.f32 %v303_v60  ;;  %534 = vmatpush1.msra.mxu0 %v1898_v56  ;;  %1845 = vmatpush1.msra.mxu1 %v1898_v56  ;;  %v241_v63 = vpop.permute.xlu0 %240 }
  0xb0   :  { %1913 = vtanh.f32 %v304_v61 }
  0xb1   :  { %v123_v1 = vpop.permute.xlu1 %122  ;;  %1915 = vtanh.f32 %v302_v62 }
  0xb2   :  { %v191_v28 = vmul.f32 %v2433_v29, %v123_v1  ;;  %v192_v31 = vmul.f32 %v2435_v30, %v123_v1 }
  0xb3   :  { %v2447_v2 = vpop.permute.xlu0 %228 }
  0xb5   :  { %v118_v23 = vpop.permute.xlu1 %117 }
  0xb6   :  { %v189_v38 = vmul.f32 %v2433_v29, %v118_v23  ;;  %v190_v41 = vmul.f32 %v2435_v30, %v118_v23 }
  0xb7   :  { %v1902_v24 = vpop.eup %1901  ;;  %v2451_v25 = vpop.permute.xlu0 %216 }
  0xb8   :  { %v1904_v26 = vpop.eup %1903 }
  0xb9   :  { %v1906_v27 = vpop.eup %1905  ;;  %535 = vmatprep.subr.mxu0 %v1904_v26  ;;  %1828 = vmatprep.subr.mxu1 %v1904_v26 }
  0xba   :  { %v1908_v32 = vpop.eup %1907  ;;  %536 = vmatpush1.msra.mxu0 %v1902_v24  ;;  %1846 = vmatpush1.msra.mxu1 %v1902_v24  ;;  %v249_v33 = vpop.permute.xlu1 %248 }
  0xbb   :  { %v1910_v34 = vpop.eup %1909  ;;  %v299_v35 = vadd.f32 %v249_v33, %v191_v28  ;;  %v300_v36 = vadd.f32 %v249_v33, %v192_v31  ;;  %537 = vmatprep.subr.mxu0 %v1908_v32  ;;  %1829 = vmatprep.subr.mxu1 %v1908_v32 }
  0xbc   :  { %v1912_v37 = vpop.eup %1911  ;;  %538 = vmatpush1.msra.mxu0 %v1906_v27  ;;  %1847 = vmatpush1.msra.mxu1 %v1906_v27  ;;  %v113_v39 = vpop.permute.xlu0 %112 }
  0xbd   :  { %v1914_v40 = vpop.eup %1913  ;;  %1917 = vtanh.f32 %v299_v35  ;;  %v187_v42 = vmul.f32 %v2433_v29, %v113_v39  ;;  %v188_v43 = vmul.f32 %v2435_v30, %v113_v39 }
  0xbe   :  { %v1916_v44 = vpop.eup %1915  ;;  %1919 = vtanh.f32 %v300_v36  ;;  %539 = vmatprep.subr.mxu0 %v1914_v40  ;;  %1830 = vmatprep.subr.mxu1 %v1914_v40  ;;  %v245_v45 = vpop.permute.xlu1 %244 }
  0xbf   :  { %v297_v46 = vadd.f32 %v245_v45, %v189_v38  ;;  %v298_v47 = vadd.f32 %v245_v45, %v190_v41  ;;  %540 = vmatpush1.msra.mxu0 %v1912_v37  ;;  %1848 = vmatpush1.msra.mxu1 %v1912_v37  ;;  %v295_v48 = vadd.f32 %v241_v63, %v187_v42 }
  0xc0   :  { %v296_v49 = vadd.f32 %v241_v63, %v188_v43  ;;  %541 = vmatprep.subr.mxu0 %v1916_v44  ;;  %1831 = vmatprep.subr.mxu1 %v1916_v44  ;;  %v98_v52 = vpop.permute.xlu0 %97 }
  0xc1   :  { %1921 = vtanh.f32 %v297_v46  ;;  %542 = vmatpush1.msra.mxu0 %v1910_v34  ;;  %1849 = vmatpush1.msra.mxu1 %v1910_v34  ;;  %v182_v54 = vmul.f32 %v2435_v30, %v98_v52  ;;  %v181_v61 = vmul.f32 %v2433_v29, %v98_v52 }
  0xc2   :  { %1923 = vtanh.f32 %v298_v47 }
  0xc3   :  { %v108_v50 = vpop.permute.xlu1 %107  ;;  %1925 = vtanh.f32 %v295_v48  ;;  %v290_v63 = vadd.f32 %v2447_v2, %v182_v54  ;;  %v289_v28 = vadd.f32 %v2447_v2, %v181_v61 }
  0xc4   :  { %1927 = vtanh.f32 %v296_v49  ;;  %v185_v56 = vmul.f32 %v2433_v29, %v108_v50  ;;  %v186_v57 = vmul.f32 %v2435_v30, %v108_v50  ;;  %v83_v36 = vpop.permute.xlu0 %82 }
  0xc5   :  { %v176_v44 = vmul.f32 %v2435_v30, %v83_v36  ;;  %v175_v46 = vmul.f32 %v2433_v29, %v83_v36 }
  0xc7   :  { %v103_v51 = vpop.permute.xlu1 %102  ;;  %v283_v54 = vadd.f32 %v2451_v25, %v175_v46 }
  0xc8   :  { %v183_v21 = vmul.f32 %v2433_v29, %v103_v51  ;;  %v184_v23 = vmul.f32 %v2435_v30, %v103_v51 }
  0xca   :  { %v1918_v53 = vpop.eup %1917 }
  0xcb   :  { %v1920_v55 = vpop.eup %1919 }
  0xcc   :  { %543 = vmatprep.subr.mxu0 %v1920_v55  ;;  %1832 = vmatprep.subr.mxu1 %v1920_v55  ;;  %v237_v58 = vpop.permute.xlu1 %236 }
  0xcd   :  { %v293_v59 = vadd.f32 %v237_v58, %v185_v56  ;;  %v294_v60 = vadd.f32 %v237_v58, %v186_v57  ;;  %544 = vmatpush1.msra.mxu0 %v1918_v53  ;;  %1850 = vmatpush1.msra.mxu1 %v1918_v53  ;;  %v284_v53 = vadd.f32 %v2451_v25, %v176_v44  ;;  %v158_v57 = vpop.permute.xlu0 %157 }
  0xce   :  { %v1922_v62 = vpop.eup %1921 }
  0xcf   :  { %v1924_v1 = vpop.eup %1923  ;;  %1929 = vtanh.f32 %v293_v59 }
  0xd0   :  { %v1926_v24 = vpop.eup %1925  ;;  %1931 = vtanh.f32 %v294_v60  ;;  %545 = vmatprep.subr.mxu0 %v1924_v1  ;;  %1833 = vmatprep.subr.mxu1 %v1924_v1  ;;  %v233_v26 = vpop.permute.xlu1 %232 }
  0xd1   :  { %v1928_v27 = vpop.eup %1927  ;;  %v291_v31 = vadd.f32 %v233_v26, %v183_v21  ;;  %v292_v32 = vadd.f32 %v233_v26, %v184_v23  ;;  %546 = vmatpush1.msra.mxu0 %v1922_v62  ;;  %1851 = vmatpush1.msra.mxu1 %v1922_v62  ;;  %1933 = vtanh.f32 %v290_v63  ;;  %v206_v21 = vmul.f32 %v2435_v30, %v158_v57  ;;  %v277_v26 = vpop.permute.xlu0 %276 }
  0xd2   :  { %547 = vmatprep.subr.mxu0 %v1928_v27  ;;  %1834 = vmatprep.subr.mxu1 %v1928_v27 }
  0xd3   :  { %1935 = vtanh.f32 %v291_v31  ;;  %548 = vmatpush1.msra.mxu0 %v1926_v24  ;;  %1852 = vmatpush1.msra.mxu1 %v1926_v24  ;;  %v205_v24 = vmul.f32 %v2433_v29, %v158_v57  ;;  %v374_v57 = vld [vmem:[#allocation2 + $0x20] sm:$0xff] }
  0xd4   :  { %1937 = vtanh.f32 %v292_v32 }
  0xd5   :  { %1939 = vtanh.f32 %v289_v28  ;;  %v93_v33 = vpop.permute.xlu1 %92  ;;  %v313_v36 = vadd.f32 %v277_v26, %v205_v24  ;;  %v399_v24 = vld [vmem:[#allocation2 + $0xe8] sm:$0xff] }
  0xd6   :  { %v179_v37 = vmul.f32 %v2433_v29, %v93_v33  ;;  %v180_v38 = vmul.f32 %v2435_v30, %v93_v33 }
  0xd9   :  { %v88_v2 = vpop.permute.xlu1 %87 }
  0xda   :  { %v177_v47 = vmul.f32 %v2433_v29, %v88_v2  ;;  %v178_v48 = vmul.f32 %v2435_v30, %v88_v2 }
  0xdc   :  { %v1930_v34 = vpop.eup %1929 }
  0xdd   :  { %v1932_v35 = vpop.eup %1931 }
  0xde   :  { %549 = vmatprep.subr.mxu0 %v1932_v35  ;;  %1835 = vmatprep.subr.mxu1 %v1932_v35  ;;  %v225_v39 = vpop.permute.xlu1 %224  ;;  %v1934_v40 = vpop.eup %1933  ;;  %v314_v35 = vadd.f32 %v277_v26, %v206_v21  ;;  %v396_v21 = vld [vmem:[#allocation2 + $0xd0] sm:$0xff] }
  0xdf   :  { %v287_v41 = vadd.f32 %v225_v39, %v179_v37  ;;  %v288_v42 = vadd.f32 %v225_v39, %v180_v38  ;;  %550 = vmatpush1.msra.mxu0 %v1930_v34  ;;  %1853 = vmatpush1.msra.mxu1 %v1930_v34  ;;  %v380_v26 = vld [vmem:[#allocation2 + $0x50] sm:$0xff] }
  0xe0   :  { %v1936_v43 = vpop.eup %1935 }
  0xe1   :  { %v1938_v45 = vpop.eup %1937  ;;  %1941 = vtanh.f32 %v287_v41 }
  0xe2   :  { %v1940_v49 = vpop.eup %1939  ;;  %1943 = vtanh.f32 %v288_v42  ;;  %551 = vmatprep.subr.mxu0 %v1938_v45  ;;  %1836 = vmatprep.subr.mxu1 %v1938_v45  ;;  %v221_v50 = vpop.permute.xlu1 %220 }
  0xe3   :  { %v285_v51 = vadd.f32 %v221_v50, %v177_v47  ;;  %v286_v52 = vadd.f32 %v221_v50, %v178_v48  ;;  %552 = vmatpush1.msra.mxu0 %v1936_v43  ;;  %1854 = vmatpush1.msra.mxu1 %v1936_v43  ;;  %v388_v50 = vld [vmem:[#allocation2 + $0x90] sm:$0xff] }
  0xe4   :  { %553 = vmatprep.subr.mxu0 %v1934_v40  ;;  %1837 = vmatprep.subr.mxu1 %v1934_v40 }
  0xe5   :  { %1945 = vtanh.f32 %v285_v51  ;;  %554 = vmatpush1.msra.mxu0 %v1940_v49  ;;  %1855 = vmatpush1.msra.mxu1 %v1940_v49  ;;  %v370_v49 = vld [vmem:[#allocation2] sm:$0xff]  ;;  %v373_v51 = vld [vmem:[#allocation2 + $0x18] sm:$0xff] }
  0xe6   :  { %1947 = vtanh.f32 %v286_v52  ;;  %v391_v52 = vld [vmem:[#allocation2 + $0xa8] sm:$0xff] }
  0xe7   :  { %v78_v55 = vpop.permute.xlu1 %77  ;;  %1949 = vtanh.f32 %v284_v53  ;;  %v372_v53 = vld [vmem:[#allocation2 + $0x10] sm:$0xff] }
  0xe8   :  { %1951 = vtanh.f32 %v283_v54  ;;  %v173_v60 = vmul.f32 %v2433_v29, %v78_v55  ;;  %v174_v61 = vmul.f32 %v2435_v30, %v78_v55  ;;  %v390_v54 = vld [vmem:[#allocation2 + $0xa0] sm:$0xff]  ;;  %v375_v55 = vld [vmem:[#allocation2 + $0x28] sm:$0xff] }
  0xeb   :  { %v73_v56 = vpop.permute.xlu1 %72 }
  0xec   :  { %v171_v27 = vmul.f32 %v2433_v29, %v73_v56  ;;  %v172_v28 = vmul.f32 %v2435_v30, %v73_v56  ;;  %v393_v56 = vld [vmem:[#allocation2 + $0xb8] sm:$0xff] }
  0xee   :  { %v1942_v58 = vpop.eup %1941 }
  0xef   :  { %v1944_v59 = vpop.eup %1943 }
  0xf0   :  { %555 = vmatprep.subr.mxu0 %v1944_v59  ;;  %1838 = vmatprep.subr.mxu1 %v1944_v59  ;;  %v213_v62 = vpop.permute.xlu1 %212  ;;  %v377_v59 = vld [vmem:[#allocation2 + $0x38] sm:$0xff] }
  0xf1   :  { %v281_v63 = vadd.f32 %v213_v62, %v173_v60  ;;  %v282_v25 = vadd.f32 %v213_v62, %v174_v61  ;;  %556 = vmatpush1.msra.mxu0 %v1942_v58  ;;  %1856 = vmatpush1.msra.mxu1 %v1942_v58  ;;  %v392_v58 = vld [vmem:[#allocation2 + $0xb0] sm:$0xff]  ;;  %v395_v60 = vld [vmem:[#allocation2 + $0xc8] sm:$0xff]  ;;  %v394_v62 = vld [vmem:[#allocation2 + $0xc0] sm:$0xff] }
  0xf2   :  { %v1946_v1 = vpop.eup %1945  ;;  %v376_v61 = vld [vmem:[#allocation2 + $0x30] sm:$0xff] }
  0xf3   :  { %v1948_v23 = vpop.eup %1947  ;;  %1953 = vtanh.f32 %v281_v63  ;;  %v379_v63 = vld [vmem:[#allocation2 + $0x48] sm:$0xff] }
  0xf4   :  { %1955 = vtanh.f32 %v282_v25  ;;  %557 = vmatprep.subr.mxu0 %v1948_v23  ;;  %1839 = vmatprep.subr.mxu1 %v1948_v23  ;;  %v209_v31 = vpop.permute.xlu1 %208  ;;  %v1950_v32 = vpop.eup %1949  ;;  %v397_v25 = vld [vmem:[#allocation2 + $0xd8] sm:$0xff] }
  0xf5   :  { %v279_v33 = vadd.f32 %v209_v31, %v171_v27  ;;  %v280_v2 = vadd.f32 %v209_v31, %v172_v28  ;;  %558 = vmatpush1.msra.mxu0 %v1946_v1  ;;  %1857 = vmatpush1.msra.mxu1 %v1946_v1  ;;  %v1952_v34 = vpop.eup %1951  ;;  %v378_v1 = vld [vmem:[#allocation2 + $0x40] sm:$0xff]  ;;  %v381_v23 = vld [vmem:[#allocation2 + $0x58] sm:$0xff]  ;;  %v383_v28 = vld [vmem:[#allocation2 + $0x68] sm:$0xff] }
  0xf6   :  { %559 = vmatprep.subr.mxu0 %v1950_v32  ;;  %1840 = vmatprep.subr.mxu1 %v1950_v32  ;;  %v398_v27 = vld [vmem:[#allocation2 + $0xe0] sm:$0xff]  ;;  %v401_v31 = vld [vmem:[#allocation2 + $0xf8] sm:$0xff] }
  0xf7   :  { %1957 = vtanh.f32 %v279_v33  ;;  %560 = vmatpush1.msra.mxu0 %v1952_v34  ;;  %1858 = vmatpush1.msra.mxu1 %v1952_v34  ;;  %v382_v32 = vld [vmem:[#allocation2 + $0x60] sm:$0xff]  ;;  %v400_v33 = vld [vmem:[#allocation2 + $0xf0] sm:$0xff]  ;;  %v403_v34 = vld [vmem:[#allocation2 + $0x108] sm:$0xff] }
  0xf8   :  { %1959 = vtanh.f32 %v280_v2  ;;  %v385_v2 = vld [vmem:[#allocation2 + $0x78] sm:$0xff] }
  0xf9   :  { %v153_v37 = vpop.permute.xlu1 %152  ;;  %1961 = vtanh.f32 %v314_v35  ;;  %v384_v35 = vld [vmem:[#allocation2 + $0x70] sm:$0xff] }
  0xfa   :  { %1963 = vtanh.f32 %v313_v36  ;;  %v203_v38 = vmul.f32 %v2433_v29, %v153_v37  ;;  %v204_v39 = vmul.f32 %v2435_v30, %v153_v37  ;;  %v402_v36 = vld [vmem:[#allocation2 + $0x100] sm:$0xff]  ;;  %v387_v37 = vld [vmem:[#allocation2 + $0x88] sm:$0xff] }
  0xfe   :  { %v273_v40 = vpop.permute.xlu1 %272 }
  0xff   :  { %v311_v41 = vadd.f32 %v273_v40, %v203_v38  ;;  %v312_v42 = vadd.f32 %v273_v40, %v204_v39  ;;  %v405_v38 = vld [vmem:[#allocation2 + $0x118] sm:$0xff]  ;;  %v386_v39 = vld [vmem:[#allocation2 + $0x80] sm:$0xff]  ;;  %v404_v40 = vld [vmem:[#allocation2 + $0x110] sm:$0xff] }
 0x100   :  { %v1954_v43 = vpop.eup %1953 }
 0x101   :  { %v1956_v44 = vpop.eup %1955  ;;  %1965 = vtanh.f32 %v311_v41  ;;  %v744_v41 = vld [vmem:[#allocation2 + $0x128] sm:$0xff] }
 0x102   :  { %1967 = vtanh.f32 %v312_v42  ;;  %561 = vmatprep.subr.mxu0 %v1956_v44  ;;  %1841 = vmatprep.subr.mxu1 %v1956_v44  ;;  %v2240_v42 = vmov 3  }
 0x103   :  { %562 = vmatpush1.msra.mxu0 %v1954_v43  ;;  %1859 = vmatpush1.msra.mxu1 %v1954_v43 }
 0x104   :  { %v1958_v45 = vpop.eup %1957  ;;  %1893 = vset.pattern.permute.xlu0 %v2240_v42  ;;  %1894 = vset.pattern.permute.xlu1 %v2240_v42 }
 0x105   :  { %v1960_v46 = vpop.eup %1959  ;;  %840 = vperm.xlu0 %1893, %v2283_v0   ;;  %836 = vperm.xlu1 %1894, %v2292_v3  }
 0x106   :  { %563 = vmatprep.subr.mxu0 %v1960_v46  ;;  %1842 = vmatprep.subr.mxu1 %v1960_v46  ;;  %v1962_v47 = vpop.eup %1961 }
 0x107   :  { %564 = vmatpush1.msra.mxu0 %v1958_v45  ;;  %1860 = vmatpush1.msra.mxu1 %v1958_v45  ;;  %v1964_v29 = vpop.eup %1963 }
 0x108   :  { %593 = vmatprep.subr.mxu0 %v1962_v47  ;;  %1843 = vmatprep.subr.mxu1 %v1962_v47 }
 0x109   :  { %594 = vmatpush2.msra.mxu0 %v1964_v29  ;;  %1861 = vmatpush2.msra.mxu1 %v1964_v29 }
 0x10a   :  { %828 = vperm.xlu0 %1893, %v2310_v6   ;;  %832 = vperm.xlu1 %1894, %v2297_v4  }
 0x10e   :  { %v1966_v30 = vpop.eup %1965  ;;  %820 = vperm.xlu0 %1893, %v2328_v8   ;;  %824 = vperm.xlu1 %1894, %v2305_v5   ;;  %v468_v5 = vpop.permute.xlu1 %467 }
 0x10f   :  { %v1968_v48 = vpop.eup %1967 }
 0x110   :  { %595 = vmatprep.subr.mxu0 %v1968_v48  ;;  %1844 = vmatprep.subr.mxu1 %v1968_v48 }
 0x111   :  { %596 = vmatpush2.msra.mxu0 %v1966_v30  ;;  %1862 = vmatpush2.msra.mxu1 %v1966_v30 }
 0x112   :  { %598 = vmatmul.mubr.f32.vlgmr.msra.gmra.mxu0 %v370_v49  ;;  %652 = vmatmul.mubr.f32.vlgmr.msra.gmra.mxu1 %v388_v50 }
 0x113   :  { %1767 = vmatprep.mubr.msk.f32.mxu0 %vm478_vm0, %v373_v51  ;;  %1776 = vmatprep.mubr.msk.f32.mxu1 %vm478_vm0, %v391_v52 }
 0x114   :  { %812 = vperm.xlu0 %1893, %v2323_v7   ;;  %816 = vperm.xlu1 %1894, %v2341_v10  }
 0x116   :  { %604 = vmatmul.mubr.f32.gmra.mxu0 %v372_v53  ;;  %658 = vmatmul.mubr.f32.gmra.mxu1 %v390_v54 }
 0x117   :  { %1768 = vmatprep.mubr.msk.f32.mxu0 %vm478_vm0, %v375_v55  ;;  %1777 = vmatprep.mubr.msk.f32.mxu1 %vm478_vm0, %v393_v56 }
 0x118   :  { %804 = vperm.xlu0 %1893, %v2367_v13   ;;  %808 = vperm.xlu1 %1894, %v2359_v12   ;;  %v460_v13 = vpop.permute.xlu1 %459 }
 0x11a   :  { %610 = vmatmul.mubr.f32.gmra.mxu0 %v374_v57  ;;  %664 = vmatmul.mubr.f32.gmra.mxu1 %v392_v58 }
 0x11b   :  { %1769 = vmatprep.mubr.msk.f32.mxu0 %vm478_vm0, %v377_v59  ;;  %1778 = vmatprep.mubr.msk.f32.mxu1 %vm478_vm0, %v395_v60 }
 0x11c   :  { %796 = vperm.xlu0 %1893, %v2385_v15   ;;  %800 = vperm.xlu1 %1894, %v2335_v9   ;;  %v464_v15 = vpop.permute.xlu0 %463  ;;  %v456_v50 = vpop.permute.xlu1 %455 }
 0x11e   :  { %616 = vmatmul.mubr.f32.gmra.mxu0 %v376_v61  ;;  %670 = vmatmul.mubr.f32.gmra.mxu1 %v394_v62 }
 0x11f   :  { %1770 = vmatprep.mubr.msk.f32.mxu0 %vm478_vm0, %v379_v63  ;;  %1779 = vmatprep.mubr.msk.f32.mxu1 %vm478_vm0, %v397_v25 }
 0x120   :  { %848 = vperm.xlu0 %1893, %v2373_v14   ;;  %792 = vperm.xlu1 %1894, %v2392_v16   ;;  %v452_v53 = vpop.permute.xlu0 %451 }
 0x122   :  { %622 = vmatmul.mubr.f32.gmra.mxu0 %v378_v1  ;;  %676 = vmatmul.mubr.f32.gmra.mxu1 %v396_v21 }
 0x123   :  { %1771 = vmatprep.mubr.msk.f32.mxu0 %vm478_vm0, %v381_v23  ;;  %1780 = vmatprep.mubr.msk.f32.mxu1 %vm478_vm0, %v399_v24 }
 0x124   :  { %788 = vperm.xlu0 %1893, %v2347_v11   ;;  %844 = vperm.xlu1 %1894, %v2417_v19   ;;  %v448_v11 = vpop.permute.xlu1 %447  ;;  %v444_v59 = vpop.permute.xlu0 %443 }
 0x126   :  { %628 = vmatmul.mubr.f32.gmra.mxu0 %v380_v26  ;;  %682 = vmatmul.mubr.f32.gmra.mxu1 %v398_v27 }
 0x127   :  { %1772 = vmatprep.mubr.msk.f32.mxu0 %vm478_vm0, %v383_v28  ;;  %1781 = vmatprep.mubr.msk.f32.mxu1 %vm478_vm0, %v401_v31 }
 0x128   :  { %780 = vperm.xlu0 %1893, %v2408_v18   ;;  %784 = vperm.xlu1 %1894, %v2401_v17   ;;  %v440_v25 = vpop.permute.xlu1 %439  ;;  %v436_v24 = vpop.permute.xlu0 %435 }
 0x12a   :  { %634 = vmatmul.mubr.f32.gmra.mxu0 %v382_v32  ;;  %688 = vmatmul.mubr.f32.gmra.mxu1 %v400_v33 }
 0x12b   :  { %1773 = vmatprep.mubr.msk.f32.mxu0 %vm478_vm0, %v385_v2  ;;  %1782 = vmatprep.mubr.msk.f32.mxu1 %vm478_vm0, %v403_v34 }
 0x12c   :  { %v432_v31 = vpop.permute.xlu1 %431 }
 0x12e   :  { %640 = vmatmul.mubr.f32.gmra.mxu0 %v384_v35  ;;  %694 = vmatmul.mubr.f32.gmra.mxu1 %v402_v36 }
 0x12f   :  { %1774 = vmatprep.mubr.msk.f32.mxu0 %vm478_vm0, %v387_v37  ;;  %1783 = vmatprep.mubr.msk.f32.mxu1 %vm478_vm0, %v405_v38  ;;  %v428_v37 = vpop.permute.xlu0 %427 }
 0x132   :  { %646 = vmatmul.mubr.f32.gmra.mxu0 %v386_v39  ;;  %700 = vmatmul.mubr.f32.gmra.mxu1 %v404_v40  ;;  %v424_v39 = vpop.permute.xlu1 %423 }
 0x133   :  { %1784 = vmatprep.mubr.msk.f32.mxu1 %vm478_vm0, %v744_v41 }
 0x1d2   :  { %v2524_v43 = vpop.f32.mrf.mxu0  ;;  %v2526_v44 = vpop.f32.mrf.mxu1 }
 0x1d3   :  { %v654_v36 = vadd.f32 %v2526_v44, %v444_v59  ;;  %v420_v44 = vpop.permute.xlu0 %419 }
 0x1d4   :  { %v2528_v45 = vpop.f32.mrf.mxu0  ;;  %v2530_v0 = vpop.f32.mrf.mxu1 }
 0x1d5   :  { %v656_v35 = vadd.f32 %v2530_v0, %v444_v59 }
 0x1d6   :  { %v2534_v3 = vpop.f32.mrf.mxu0  ;;  %v659_v4 = vpop.f32.mrf.mxu1 }
 0x1d7   :  { %v660_v2 = vadd.f32 %v659_v4, %v448_v11 }
 0x1d8   :  { %v2536_v6 = vpop.f32.mrf.mxu0  ;;  %v661_v7 = vpop.f32.mrf.mxu1 }
 0x1d9   :  { %v662_v33 = vadd.f32 %v661_v7, %v448_v11 }
 0x1da   :  { %v2540_v8 = vpop.f32.mrf.mxu0  ;;  %v665_v10 = vpop.f32.mrf.mxu1 }
 0x1db   :  { %v666_v32 = vadd.f32 %v665_v10, %v452_v53 }
 0x1dc   :  { %v2542_v46 = vpop.f32.mrf.mxu0  ;;  %v667_v47 = vpop.f32.mrf.mxu1 }
 0x1dd   :  { %v668_v28 = vadd.f32 %v667_v47, %v452_v53 }
 0x1de   :  { %v2546_v12 = vpop.f32.mrf.mxu0  ;;  %v671_v29 = vpop.f32.mrf.mxu1 }
 0x1df   :  { %v672_v26 = vadd.f32 %v671_v29, %v456_v50 }
 0x1e0   :  { %v2548_v30 = vpop.f32.mrf.mxu0  ;;  %v673_v48 = vpop.f32.mrf.mxu1 }
 0x1e1   :  { %v674_v23 = vadd.f32 %v673_v48, %v456_v50  ;;  %v620_v11 = vadd.f32 %v2548_v30, %v420_v44 }
 0x1e2   :  { %v2552_v9 = vpop.f32.mrf.mxu0  ;;  %v677_v49 = vpop.f32.mrf.mxu1 }
 0x1e3   :  { %v678_v21 = vadd.f32 %v677_v49, %v460_v13 }
 0x1e4   :  { %v2554_v51 = vpop.f32.mrf.mxu0  ;;  %v679_v14 = vpop.f32.mrf.mxu1 }
 0x1e5   :  { %v680_v1 = vadd.f32 %v679_v14, %v460_v13 }
 0x1e6   :  { %v2558_v16 = vpop.f32.mrf.mxu0  ;;  %v683_v52 = vpop.f32.mrf.mxu1 }
 0x1e7   :  { %v684_v18 = vadd.f32 %v683_v52, %v464_v15  ;;  %v630_v49 = vadd.f32 %v2558_v16, %v428_v37  ;;  %v626_v52 = vadd.f32 %v2554_v51, %v424_v39  ;;  %v412_v16 = vpop.permute.xlu0 %411 }
 0x1e8   :  { %v631_v54 = vpop.f32.mrf.mxu0  ;;  %v685_v55 = vpop.f32.mrf.mxu1 }
 0x1e9   :  { %v686_v62 = vadd.f32 %v685_v55, %v464_v15  ;;  %v632_v29 = vadd.f32 %v631_v54, %v428_v37  ;;  %v416_v15 = vpop.permute.xlu1 %415  ;;  %v624_v55 = vadd.f32 %v2552_v9, %v424_v39 }
 0x1ea   :  { %v635_v56 = vpop.f32.mrf.mxu0  ;;  %v689_v19 = vpop.f32.mrf.mxu1 }
 0x1eb   :  { %v690_v60 = vadd.f32 %v689_v19, %v468_v5  ;;  %v636_v47 = vadd.f32 %v635_v56, %v432_v31  ;;  %v618_v19 = vadd.f32 %v2546_v12, %v420_v44  ;;  %v748_v44 = vld [vmem:[#allocation2 + $0x148] sm:$0xff] }
 0x1ec   :  { %v637_v57 = vpop.f32.mrf.mxu0  ;;  %v691_v58 = vpop.f32.mrf.mxu1 }
 0x1ed   :  { %v692_v61 = vadd.f32 %v691_v58, %v468_v5  ;;  %v638_v10 = vadd.f32 %v637_v57, %v432_v31  ;;  %v614_v58 = vadd.f32 %v2542_v46, %v416_v15  ;;  %v408_v59 = vpop.permute.xlu1 %407 }
 0x1ee   :  { %v641_v63 = vpop.f32.mrf.mxu0  ;;  %v2562_v4 = vpop.f32.mrf.mxu1 }
 0x1ef   :  { %1969 = vtanh.f32 %v692_v61  ;;  %v642_v5 = vadd.f32 %v641_v63, %v436_v24  ;;  %v608_v61 = vadd.f32 %v2536_v6, %v412_v16 }
 0x1f0   :  { %v643_v17 = vpop.f32.mrf.mxu0  ;;  %1971 = vtanh.f32 %v690_v60  ;;  %v697_v50 = vpop.f32.mrf.mxu1  ;;  %v612_v60 = vadd.f32 %v2540_v8, %v416_v15  ;;  %v600_v8 = vadd.f32 %v2524_v43, %v408_v59  ;;  %v751_v15 = vld [vmem:[#allocation2 + $0x160] sm:$0xff] }
 0x1f1   :  { %1973 = vtanh.f32 %v686_v62  ;;  %v644_v41 = vadd.f32 %v643_v17, %v436_v24  ;;  %v606_v62 = vadd.f32 %v2534_v3, %v412_v16  ;;  %v472_v3 = vpop.permute.xlu1 %471  ;;  %v761_v16 = vld [vmem:[#allocation2 + $0x1b0] sm:$0xff] }
 0x1f2   :  { %1975 = vtanh.f32 %v684_v18  ;;  %v647_v27 = vpop.f32.mrf.mxu0  ;;  %v701_v57 = vpop.f32.mrf.mxu1  ;;  %v696_v43 = vadd.f32 %v2562_v4, %v472_v3  ;;  %v743_v4 = vld [vmem:[#allocation2 + $0x120] sm:$0xff] }
 0x1f3   :  { %1977 = vtanh.f32 %v680_v1  ;;  %v648_v40 = vadd.f32 %v647_v27, %v440_v25  ;;  %v476_v1 = vpop.permute.xlu0 %475 }
 0x1f4   :  { %1979 = vtanh.f32 %v678_v21  ;;  %v649_v34 = vpop.f32.mrf.mxu0  ;;  %v703_v63 = vpop.f32.mrf.mxu1 }
 0x1f5   :  { %1981 = vtanh.f32 %v674_v23  ;;  %v650_v38 = vadd.f32 %v649_v34, %v440_v25  ;;  %v602_v25 = vadd.f32 %v2528_v45, %v408_v59  ;;  %v704_v17 = vadd.f32 %v703_v63, %v476_v1  ;;  %v767_v59 = vld [vmem:[#allocation2 + $0x1e0] sm:$0xff]  ;;  %v773_v63 = vld [vmem:[#allocation2 + $0x210] sm:$0xff] }
 0x1f6   :  { %1983 = vtanh.f32 %v672_v26  ;;  %v702_v23 = vadd.f32 %v701_v57, %v476_v1  ;;  %v698_v45 = vadd.f32 %v697_v50, %v472_v3  ;;  %v753_v50 = vld [vmem:[#allocation2 + $0x170] sm:$0xff]  ;;  %v763_v57 = vld [vmem:[#allocation2 + $0x1c0] sm:$0xff]  ;;  %v1170_v1 = vld [vmem:[#allocation2 + $0x248] sm:$0xff] }
 0x1f7   :  { %1985 = vtanh.f32 %v668_v28  ;;  %1802 = vmatprep.mubr.msk.f32.mxu0 %vm478_vm0, %v1170_v1 }
 0x1f8   :  { %1987 = vtanh.f32 %v666_v32 }
 0x1f9   :  { %1989 = vtanh.f32 %v662_v33 }
 0x1fa   :  { %1991 = vtanh.f32 %v660_v2 }
 0x1fb   :  { %1993 = vtanh.f32 %v656_v35 }
 0x1fc   :  { %v1970_v42 = vpop.eup %1969  ;;  %1995 = vtanh.f32 %v654_v36 }
 0x1fd   :  { %v1972_v7 = vpop.eup %1971  ;;  %1997 = vtanh.f32 %v650_v38  ;;  %905 = vmatprep.subr.mxu1 %v1970_v42 }
 0x1fe   :  { %v1974_v0 = vpop.eup %1973  ;;  %1999 = vtanh.f32 %v648_v40  ;;  %906 = vmatpush1.msra.mxu1 %v1972_v7 }
 0x1ff   :  { %v1976_v13 = vpop.eup %1975  ;;  %2001 = vtanh.f32 %v644_v41  ;;  %907 = vmatprep.subr.mxu1 %v1974_v0  ;;  %v745_v0 = vld [vmem:[#allocation2 + $0x130] sm:$0xff] }
 0x200   :  { %v1978_v48 = vpop.eup %1977  ;;  %2003 = vtanh.f32 %v642_v5  ;;  %908 = vmatpush1.msra.mxu1 %v1976_v13  ;;  %v750_v13 = vld [vmem:[#allocation2 + $0x158] sm:$0xff] }
 0x201   :  { %v1980_v14 = vpop.eup %1979  ;;  %2005 = vtanh.f32 %v638_v10  ;;  %909 = vmatprep.subr.mxu1 %v1978_v48  ;;  %v746_v10 = vld [vmem:[#allocation2 + $0x138] sm:$0xff]  ;;  %v752_v48 = vld [vmem:[#allocation2 + $0x168] sm:$0xff] }
 0x202   :  { %v1982_v53 = vpop.eup %1981  ;;  %2007 = vtanh.f32 %v636_v47  ;;  %910 = vmatpush1.msra.mxu1 %v1980_v14  ;;  %v747_v47 = vld [vmem:[#allocation2 + $0x140] sm:$0xff]  ;;  %v756_v14 = vld [vmem:[#allocation2 + $0x188] sm:$0xff] }
 0x203   :  { %v1984_v54 = vpop.eup %1983  ;;  %2009 = vtanh.f32 %v632_v29  ;;  %911 = vmatprep.subr.mxu1 %v1982_v53  ;;  %v749_v29 = vld [vmem:[#allocation2 + $0x150] sm:$0xff]  ;;  %v758_v53 = vld [vmem:[#allocation2 + $0x198] sm:$0xff] }
 0x204   :  { %v1986_v56 = vpop.eup %1985  ;;  %2011 = vtanh.f32 %v630_v49  ;;  %912 = vmatpush1.msra.mxu1 %v1984_v54  ;;  %v754_v49 = vld [vmem:[#allocation2 + $0x178] sm:$0xff]  ;;  %v760_v54 = vld [vmem:[#allocation2 + $0x1a8] sm:$0xff] }
 0x205   :  { %v1988_v51 = vpop.eup %1987  ;;  %2013 = vtanh.f32 %v626_v52  ;;  %913 = vmatprep.subr.mxu1 %v1986_v56  ;;  %v755_v52 = vld [vmem:[#allocation2 + $0x180] sm:$0xff]  ;;  %v762_v56 = vld [vmem:[#allocation2 + $0x1b8] sm:$0xff] }
 0x206   :  { %v1990_v9 = vpop.eup %1989  ;;  %2015 = vtanh.f32 %v624_v55  ;;  %914 = vmatpush1.msra.mxu1 %v1988_v51  ;;  %v757_v55 = vld [vmem:[#allocation2 + $0x190] sm:$0xff]  ;;  %v766_v51 = vld [vmem:[#allocation2 + $0x1d8] sm:$0xff] }
 0x207   :  { %v1992_v30 = vpop.eup %1991  ;;  %2017 = vtanh.f32 %v620_v11  ;;  %915 = vmatprep.subr.mxu1 %v1990_v9  ;;  %v759_v11 = vld [vmem:[#allocation2 + $0x1a0] sm:$0xff]  ;;  %v768_v9 = vld [vmem:[#allocation2 + $0x1e8] sm:$0xff] }
 0x208   :  { %v1994_v12 = vpop.eup %1993  ;;  %2019 = vtanh.f32 %v618_v19  ;;  %916 = vmatpush1.msra.mxu1 %v1992_v30  ;;  %v764_v19 = vld [vmem:[#allocation2 + $0x1c8] sm:$0xff]  ;;  %v769_v30 = vld [vmem:[#allocation2 + $0x1f0] sm:$0xff] }
 0x209   :  { %v1996_v46 = vpop.eup %1995  ;;  %2021 = vtanh.f32 %v614_v58  ;;  %917 = vmatprep.subr.mxu1 %v1994_v12  ;;  %v765_v58 = vld [vmem:[#allocation2 + $0x1d0] sm:$0xff]  ;;  %v771_v12 = vld [vmem:[#allocation2 + $0x200] sm:$0xff] }
 0x20a   :  { %v1998_v18 = vpop.eup %1997  ;;  %2023 = vtanh.f32 %v612_v60  ;;  %918 = vmatpush1.msra.mxu1 %v1996_v46  ;;  %v770_v60 = vld [vmem:[#allocation2 + $0x1f8] sm:$0xff]  ;;  %v776_v46 = vld [vmem:[#allocation2 + $0x228] sm:$0xff] }
 0x20b   :  { %v2000_v6 = vpop.eup %1999  ;;  %2025 = vtanh.f32 %v608_v61  ;;  %919 = vmatprep.subr.mxu1 %v1998_v18  ;;  %v772_v61 = vld [vmem:[#allocation2 + $0x208] sm:$0xff]  ;;  %v778_v18 = vld [vmem:[#allocation2 + $0x238] sm:$0xff] }
 0x20c   :  { %v2002_v21 = vpop.eup %2001  ;;  %2027 = vtanh.f32 %v606_v62  ;;  %920 = vmatpush1.msra.mxu1 %v2000_v6  ;;  %v774_v62 = vld [vmem:[#allocation2 + $0x218] sm:$0xff] }
 0x20d   :  { %v2004_v24 = vpop.eup %2003  ;;  %2029 = vtanh.f32 %v602_v25  ;;  %921 = vmatprep.subr.mxu1 %v2002_v21  ;;  %v775_v25 = vld [vmem:[#allocation2 + $0x220] sm:$0xff] }
 0x20e   :  { %v2006_v26 = vpop.eup %2005  ;;  %2031 = vtanh.f32 %v600_v8  ;;  %922 = vmatpush1.msra.mxu1 %v2004_v24  ;;  %v777_v8 = vld [vmem:[#allocation2 + $0x230] sm:$0xff] }
 0x20f   :  { %v2008_v27 = vpop.eup %2007  ;;  %2033 = vtanh.f32 %v704_v17  ;;  %923 = vmatprep.subr.mxu1 %v2006_v26 }
 0x210   :  { %v2010_v28 = vpop.eup %2009  ;;  %2035 = vtanh.f32 %v702_v23  ;;  %924 = vmatpush1.msra.mxu1 %v2008_v27  ;;  %v2241_v27 = vmov 4  }
 0x211   :  { %v2012_v31 = vpop.eup %2011  ;;  %2037 = vtanh.f32 %v698_v45  ;;  %925 = vmatprep.subr.mxu1 %v2010_v28  ;;  %1895 = vset.pattern.permute.xlu1 %v2241_v27 }
 0x212   :  { %v2014_v32 = vpop.eup %2013  ;;  %2039 = vtanh.f32 %v696_v43  ;;  %926 = vmatpush1.msra.mxu1 %v2012_v31  ;;  %1896 = vset.pattern.permute.xlu0 %v2241_v27  ;;  %v2157_v31 = vld [vmem:[%s2784_s2 + $0x78] sm:$0xff] }
 0x213   :  { %v2016_v33 = vpop.eup %2015  ;;  %927 = vmatprep.subr.mxu1 %v2014_v32  ;;  %1266 = vperm.xlu1 %1895, %v2157_v31   ;;  %v2158_v32 = vld [vmem:[%s2784_s2 + $0x70] sm:$0xff] }
 0x214   :  { %v2018_v2 = vpop.eup %2017  ;;  %928 = vmatpush1.msra.mxu1 %v2016_v33  ;;  %1262 = vperm.xlu0 %1896, %v2158_v32  }
 0x215   :  { %v2020_v34 = vpop.eup %2019  ;;  %929 = vmatprep.subr.mxu1 %v2018_v2 }
 0x216   :  { %v2022_v35 = vpop.eup %2021  ;;  %930 = vmatpush1.msra.mxu1 %v2020_v34  ;;  %v2159_v34 = vld [vmem:[%s2784_s2 + $0x68] sm:$0xff] }
 0x217   :  { %v2024_v36 = vpop.eup %2023  ;;  %931 = vmatprep.subr.mxu1 %v2022_v35  ;;  %1258 = vperm.xlu1 %1895, %v2159_v34   ;;  %v2160_v35 = vld [vmem:[%s2784_s2 + $0x58] sm:$0xff] }
 0x218   :  { %v2026_v37 = vpop.eup %2025  ;;  %932 = vmatpush1.msra.mxu1 %v2024_v36  ;;  %1250 = vperm.xlu0 %1896, %v2160_v35  }
 0x219   :  { %v2028_v38 = vpop.eup %2027  ;;  %933 = vmatprep.subr.mxu1 %v2026_v37 }
 0x21a   :  { %v2030_v39 = vpop.eup %2029  ;;  %934 = vmatpush1.msra.mxu1 %v2028_v38  ;;  %v2161_v38 = vld [vmem:[%s2784_s2 + $0x60] sm:$0xff] }
 0x21b   :  { %v2032_v40 = vpop.eup %2031  ;;  %935 = vmatprep.subr.mxu1 %v2030_v39  ;;  %1254 = vperm.xlu1 %1895, %v2161_v38   ;;  %v2162_v39 = vld [vmem:[%s2784_s2 + $0x48] sm:$0xff] }
 0x21c   :  { %v2034_v41 = vpop.eup %2033  ;;  %936 = vmatpush1.msra.mxu1 %v2032_v40  ;;  %1242 = vperm.xlu0 %1896, %v2162_v39  }
 0x21d   :  { %v2036_v42 = vpop.eup %2035  ;;  %965 = vmatprep.subr.mxu1 %v2034_v41 }
 0x21e   :  { %v2038_v5 = vpop.eup %2037  ;;  %966 = vmatpush2.msra.mxu1 %v2036_v42  ;;  %v2163_v42 = vld [vmem:[%s2784_s2 + $0x50] sm:$0xff] }
 0x21f   :  { %v2040_v7 = vpop.eup %2039  ;;  %967 = vmatprep.subr.mxu1 %v2038_v5  ;;  %1246 = vperm.xlu1 %1895, %v2163_v42   ;;  %v2164_v5 = vld [vmem:[%s2784_s2 + $0x38] sm:$0xff] }
 0x220   :  { %968 = vmatpush2.msra.mxu1 %v2040_v7  ;;  %1234 = vperm.xlu0 %1896, %v2164_v5  }
 0x221   :  { %970 = vmatmul.mubr.f32.vlgmr.msra.gmra.mxu1 %v743_v4 }
 0x222   :  { %1785 = vmatprep.mubr.msk.f32.mxu1 %vm478_vm0, %v746_v10  ;;  %v2165_v10 = vld [vmem:[%s2784_s2 + $0x40] sm:$0xff] }
 0x223   :  { %1238 = vperm.xlu1 %1895, %v2165_v10  }
 0x225   :  { %976 = vmatmul.mubr.f32.gmra.mxu1 %v745_v0  ;;  %v2166_v0 = vld [vmem:[%s2784_s2 + $0x88] sm:$0xff] }
 0x226   :  { %1786 = vmatprep.mubr.msk.f32.mxu1 %vm478_vm0, %v748_v44  ;;  %1274 = vperm.xlu0 %1896, %v2166_v0  }
 0x229   :  { %982 = vmatmul.mubr.f32.gmra.mxu1 %v747_v47 }
 0x22a   :  { %1787 = vmatprep.mubr.msk.f32.mxu1 %vm478_vm0, %v750_v13  ;;  %v2167_v13 = vld [vmem:[%s2784_s2 + $0x30] sm:$0xff] }
 0x22b   :  { %1230 = vperm.xlu1 %1895, %v2167_v13  }
 0x22d   :  { %988 = vmatmul.mubr.f32.gmra.mxu1 %v749_v29  ;;  %v2168_v29 = vld [vmem:[%s2784_s2 + $0x80] sm:$0xff] }
 0x22e   :  { %1788 = vmatprep.mubr.msk.f32.mxu1 %vm478_vm0, %v752_v48  ;;  %1270 = vperm.xlu0 %1896, %v2168_v29  }
 0x231   :  { %994 = vmatmul.mubr.f32.gmra.mxu1 %v751_v15 }
 0x232   :  { %1789 = vmatprep.mubr.msk.f32.mxu1 %vm478_vm0, %v754_v49  ;;  %v2169_v49 = vld [vmem:[%s2784_s2 + $0x28] sm:$0xff] }
 0x233   :  { %1226 = vperm.xlu1 %1895, %v2169_v49  }
 0x235   :  { %1000 = vmatmul.mubr.f32.gmra.mxu1 %v753_v50  ;;  %v2170_v50 = vld [vmem:[%s2784_s2 + $0x18] sm:$0xff] }
 0x236   :  { %1790 = vmatprep.mubr.msk.f32.mxu1 %vm478_vm0, %v756_v14  ;;  %1218 = vperm.xlu0 %1896, %v2170_v50  }
 0x239   :  { %1006 = vmatmul.mubr.f32.gmra.mxu1 %v755_v52 }
 0x23a   :  { %1791 = vmatprep.mubr.msk.f32.mxu1 %vm478_vm0, %v758_v53  ;;  %v2171_v53 = vld [vmem:[%s2784_s2 + $0x20] sm:$0xff] }
 0x23b   :  { %1222 = vperm.xlu1 %1895, %v2171_v53  }
 0x23d   :  { %1012 = vmatmul.mubr.f32.gmra.mxu1 %v757_v55  ;;  %v2172_v55 = vld [vmem:[%s2784_s2 + $0x8] sm:$0xff] }
 0x23e   :  { %1792 = vmatprep.mubr.msk.f32.mxu1 %vm478_vm0, %v760_v54  ;;  %1210 = vperm.xlu0 %1896, %v2172_v55   ;;  %v837_v54 = vpop.permute.xlu1 %836 }
 0x241   :  { %1018 = vmatmul.mubr.f32.gmra.mxu1 %v759_v11 }
 0x242   :  { %1793 = vmatprep.mubr.msk.f32.mxu1 %vm478_vm0, %v762_v56 }
 0x245   :  { %1024 = vmatmul.mubr.f32.gmra.mxu1 %v761_v16  ;;  %v2173_v16 = vld [vmem:[%s2784_s2 + $0x10] sm:$0xff] }
 0x246   :  { %1794 = vmatprep.mubr.msk.f32.mxu1 %vm478_vm0, %v764_v19  ;;  %1214 = vperm.xlu1 %1895, %v2173_v16   ;;  %v841_v19 = vpop.permute.xlu0 %840 }
 0x249   :  { %1030 = vmatmul.mubr.f32.gmra.mxu1 %v763_v57 }
 0x24a   :  { %1795 = vmatprep.mubr.msk.f32.mxu1 %vm478_vm0, %v766_v51  ;;  %v833_v51 = vpop.permute.xlu1 %832 }
 0x24d   :  { %1036 = vmatmul.mubr.f32.gmra.mxu1 %v765_v58 }
 0x24e   :  { %1796 = vmatprep.mubr.msk.f32.mxu1 %vm478_vm0, %v768_v9  ;;  %v2174_v9 = vld [vmem:[%s2784_s2] sm:$0xff] }
 0x24f   :  { %1206 = vperm.xlu1 %1895, %v2174_v9  }
 0x251   :  { %1042 = vmatmul.mubr.f32.gmra.mxu1 %v767_v59 }
 0x252   :  { %1797 = vmatprep.mubr.msk.f32.mxu1 %vm478_vm0, %v770_v60  ;;  %v829_v60 = vpop.permute.xlu0 %828 }
 0x255   :  { %1048 = vmatmul.mubr.f32.gmra.mxu1 %v769_v30 }
 0x256   :  { %1798 = vmatprep.mubr.msk.f32.mxu1 %vm478_vm0, %v772_v61  ;;  %v825_v61 = vpop.permute.xlu1 %824 }
 0x259   :  { %1054 = vmatmul.mubr.f32.gmra.mxu1 %v771_v12 }
 0x25a   :  { %1799 = vmatprep.mubr.msk.f32.mxu1 %vm478_vm0, %v774_v62  ;;  %v817_v27 = vpop.permute.xlu1 %816 }
 0x25d   :  { %1060 = vmatmul.mubr.f32.gmra.mxu1 %v773_v63 }
 0x25e   :  { %1800 = vmatprep.mubr.msk.f32.mxu1 %vm478_vm0, %v776_v46  ;;  %v809_v5 = vpop.permute.xlu1 %808 }
 0x261   :  { %1066 = vmatmul.mubr.f32.gmra.mxu1 %v775_v25 }
 0x262   :  { %1801 = vmatprep.mubr.msk.f32.mxu1 %vm478_vm0, %v778_v18  ;;  %v821_v18 = vpop.permute.xlu0 %820 }
 0x265   :  { %1072 = vmatmul.mubr.f32.gmra.mxu1 %v777_v8 }
 0x266   :  { %v813_v38 = vpop.permute.xlu0 %812 }
 0x26a   :  { %v805_v49 = vpop.permute.xlu0 %804 }
 0x2e1   :  { %v2594_v6 = vpop.f32.mrf.mxu1 }
 0x2e3   :  { %v2596_v17 = vpop.f32.mrf.mxu1 }
 0x2e5   :  { %v2598_v21 = vpop.f32.mrf.mxu1 }
 0x2e7   :  { %v2600_v3 = vpop.f32.mrf.mxu1 }
 0x2e9   :  { %v2602_v23 = vpop.f32.mrf.mxu1 }
 0x2eb   :  { %v2604_v24 = vpop.f32.mrf.mxu1 }
 0x2ed   :  { %v2606_v45 = vpop.f32.mrf.mxu1 }
 0x2ef   :  { %v2608_v26 = vpop.f32.mrf.mxu1 }
 0x2f1   :  { %v2610_v43 = vpop.f32.mrf.mxu1 }
 0x2f3   :  { %v2612_v28 = vpop.f32.mrf.mxu1 }
 0x2f5   :  { %v2620_v33 = vpop.f32.mrf.mxu1 }
 0x2f7   :  { %v2622_v2 = vpop.f32.mrf.mxu1 }
 0x2f9   :  { %v2630_v36 = vpop.f32.mrf.mxu1 }
 0x2fa   :  { %v1008_v55 = vadd.f32 %v2630_v36, %v805_v49 }
 0x2fb   :  { %v2632_v37 = vpop.f32.mrf.mxu1 }
 0x2fd   :  { %v2640_v40 = vpop.f32.mrf.mxu1 }
 0x2fe   :  { %v1014_v53 = vadd.f32 %v2640_v40, %v809_v5  ;;  %v797_v40 = vpop.permute.xlu0 %796 }
 0x2ff   :  { %v2642_v41 = vpop.f32.mrf.mxu1  ;;  %v998_v16 = vadd.f32 %v2612_v28, %v797_v40 }
 0x301   :  { %v2650_v4 = vpop.f32.mrf.mxu1 }
 0x302   :  { %v1020_v50 = vadd.f32 %v2650_v4, %v813_v38 }
 0x303   :  { %v2652_v7 = vpop.f32.mrf.mxu1 }
 0x304   :  { %v1022_v29 = vadd.f32 %v2652_v7, %v813_v38 }
 0x305   :  { %v1025_v44 = vpop.f32.mrf.mxu1 }
 0x306   :  { %v1026_v13 = vadd.f32 %v1025_v44, %v817_v27  ;;  %v1010_v44 = vadd.f32 %v2632_v37, %v805_v49 }
 0x307   :  { %v1027_v47 = vpop.f32.mrf.mxu1 }
 0x308   :  { %v1028_v0 = vadd.f32 %v1027_v47, %v817_v27 }
 0x309   :  { %v1031_v48 = vpop.f32.mrf.mxu1 }
 0x30a   :  { %v1032_v10 = vadd.f32 %v1031_v48, %v821_v18 }
 0x30b   :  { %v1033_v15 = vpop.f32.mrf.mxu1 }
 0x30c   :  { %v1034_v42 = vadd.f32 %v1033_v15, %v821_v18  ;;  %v801_v15 = vpop.permute.xlu1 %800 }
 0x30d   :  { %v1037_v14 = vpop.f32.mrf.mxu1 }
 0x30e   :  { %v1038_v39 = vadd.f32 %v1037_v14, %v825_v61 }
 0x30f   :  { %v1039_v52 = vpop.f32.mrf.mxu1 }
 0x310   :  { %v1040_v35 = vadd.f32 %v1039_v52, %v825_v61  ;;  %v1016_v52 = vadd.f32 %v2642_v41, %v809_v5  ;;  %v1004_v41 = vadd.f32 %v2622_v2, %v801_v15 }
 0x311   :  { %v1043_v11 = vpop.f32.mrf.mxu1 }
 0x312   :  { %v1044_v34 = vadd.f32 %v1043_v11, %v829_v60  ;;  %v1002_v11 = vadd.f32 %v2620_v33, %v801_v15 }
 0x313   :  { %v1045_v56 = vpop.f32.mrf.mxu1 }
 0x314   :  { %v1046_v32 = vadd.f32 %v1045_v56, %v829_v60 }
 0x315   :  { %v1049_v57 = vpop.f32.mrf.mxu1 }
 0x316   :  { %v1050_v31 = vadd.f32 %v1049_v57, %v833_v51  ;;  %v996_v57 = vadd.f32 %v2610_v43, %v797_v40  ;;  %v1181_v40 = vld [vmem:[#allocation2 + $0x2a0] sm:$0xff] }
 0x317   :  { %v1051_v58 = vpop.f32.mrf.mxu1 }
 0x318   :  { %v1052_v1 = vadd.f32 %v1051_v58, %v833_v51 }
 0x319   :  { %v1055_v59 = vpop.f32.mrf.mxu1 }
 0x31a   :  { %v1056_v8 = vadd.f32 %v1055_v59, %v837_v54 }
 0x31b   :  { %v1057_v30 = vpop.f32.mrf.mxu1 }
 0x31c   :  { %v1058_v46 = vadd.f32 %v1057_v30, %v837_v54 }
 0x31d   :  { %v1061_v12 = vpop.f32.mrf.mxu1 }
 0x31e   :  { %v1062_v62 = vadd.f32 %v1061_v12, %v841_v19 }
 0x31f   :  { %v1063_v63 = vpop.f32.mrf.mxu1 }
 0x320   :  { %v1064_v25 = vadd.f32 %v1063_v63, %v841_v19  ;;  %v793_v19 = vpop.permute.xlu1 %792 }
 0x321   :  { %v2688_v48 = vpop.f32.mrf.mxu1  ;;  %v992_v51 = vadd.f32 %v2608_v26, %v793_v19  ;;  %v990_v58 = vadd.f32 %v2606_v45, %v793_v19  ;;  %v849_v45 = vpop.permute.xlu0 %848  ;;  %v1187_v19 = vld [vmem:[#allocation2 + $0x2d0] sm:$0xff] }
 0x322   :  { %2041 = vtanh.f32 %v1064_v25 }
 0x323   :  { %2043 = vtanh.f32 %v1062_v62  ;;  %v1069_v56 = vpop.f32.mrf.mxu1 }
 0x324   :  { %2045 = vtanh.f32 %v1058_v46  ;;  %v845_v46 = vpop.permute.xlu1 %844 }
 0x325   :  { %2047 = vtanh.f32 %v1056_v8  ;;  %v1073_v9 = vpop.f32.mrf.mxu1  ;;  %v1070_v8 = vadd.f32 %v1069_v56, %v845_v46  ;;  %v1068_v27 = vadd.f32 %v2688_v48, %v845_v46  ;;  %v1183_v56 = vld [vmem:[#allocation2 + $0x2b0] sm:$0xff] }
 0x326   :  { %2049 = vtanh.f32 %v1052_v1  ;;  %v1074_v25 = vadd.f32 %v1073_v9, %v849_v45  ;;  %v1193_v9 = vld [vmem:[#allocation2 + $0x300] sm:$0xff] }
 0x327   :  { %2051 = vtanh.f32 %v1050_v31  ;;  %v1075_v26 = vpop.f32.mrf.mxu1 }
 0x328   :  { %2053 = vtanh.f32 %v1046_v32  ;;  %v1076_v62 = vadd.f32 %v1075_v26, %v849_v45  ;;  %v1200_v26 = vld [vmem:[#allocation2 + $0x338] sm:$0xff]  ;;  %v1201_v45 = vld [vmem:[#allocation2 + $0x340] sm:$0xff] }
 0x329   :  { %2055 = vtanh.f32 %v1044_v34 }
 0x32a   :  { %2057 = vtanh.f32 %v1040_v35  ;;  %v789_v35 = vpop.permute.xlu0 %788 }
 0x32b   :  { %2059 = vtanh.f32 %v1038_v39 }
 0x32c   :  { %2061 = vtanh.f32 %v1034_v42 }
 0x32d   :  { %2063 = vtanh.f32 %v1032_v10  ;;  %v785_v10 = vpop.permute.xlu1 %784 }
 0x32e   :  { %2065 = vtanh.f32 %v1028_v0  ;;  %v986_v0 = vadd.f32 %v2604_v24, %v789_v35  ;;  %v980_v49 = vadd.f32 %v2600_v3, %v785_v10  ;;  %v1172_v3 = vld [vmem:[#allocation2 + $0x258] sm:$0xff] }
 0x32f   :  { %v2042_v14 = vpop.eup %2041  ;;  %2067 = vtanh.f32 %v1026_v13  ;;  %v984_v13 = vadd.f32 %v2602_v23, %v789_v35 }
 0x330   :  { %v2044_v47 = vpop.eup %2043  ;;  %2069 = vtanh.f32 %v1022_v29  ;;  %1331 = vmatprep.subr.mxu0 %v2042_v14  ;;  %v781_v29 = vpop.permute.xlu0 %780 }
 0x331   :  { %v2046_v7 = vpop.eup %2045  ;;  %2071 = vtanh.f32 %v1020_v50  ;;  %1332 = vmatpush1.msra.mxu0 %v2044_v47  ;;  %v978_v50 = vadd.f32 %v2598_v21, %v785_v10  ;;  %v972_v14 = vadd.f32 %v2594_v6, %v781_v29  ;;  %v1174_v21 = vld [vmem:[#allocation2 + $0x268] sm:$0xff]  ;;  %v1173_v6 = vld [vmem:[#allocation2 + $0x260] sm:$0xff]  ;;  %v1176_v47 = vld [vmem:[#allocation2 + $0x278] sm:$0xff] }
 0x332   :  { %v2048_v4 = vpop.eup %2047  ;;  %2073 = vtanh.f32 %v1016_v52  ;;  %1333 = vmatprep.subr.mxu0 %v2046_v7  ;;  %v974_v52 = vadd.f32 %v2596_v17, %v781_v29  ;;  %v1171_v17 = vld [vmem:[#allocation2 + $0x250] sm:$0xff]  ;;  %v1178_v7 = vld [vmem:[#allocation2 + $0x288] sm:$0xff] }
 0x333   :  { %v2050_v54 = vpop.eup %2049  ;;  %2075 = vtanh.f32 %v1014_v53  ;;  %1334 = vmatpush1.msra.mxu0 %v2048_v4  ;;  %v1169_v53 = vld [vmem:[#allocation2 + $0x240] sm:$0xff]  ;;  %v1180_v4 = vld [vmem:[#allocation2 + $0x298] sm:$0xff] }
 0x334   :  { %v2052_v37 = vpop.eup %2051  ;;  %2077 = vtanh.f32 %v1010_v44  ;;  %1335 = vmatprep.subr.mxu0 %v2050_v54  ;;  %v1175_v44 = vld [vmem:[#allocation2 + $0x270] sm:$0xff]  ;;  %v1182_v54 = vld [vmem:[#allocation2 + $0x2a8] sm:$0xff] }
 0x335   :  { %v2054_v36 = vpop.eup %2053  ;;  %2079 = vtanh.f32 %v1008_v55  ;;  %1336 = vmatpush1.msra.mxu0 %v2052_v37  ;;  %v1177_v55 = vld [vmem:[#allocation2 + $0x280] sm:$0xff]  ;;  %v1186_v37 = vld [vmem:[#allocation2 + $0x2c8] sm:$0xff] }
 0x336   :  { %v2056_v2 = vpop.eup %2055  ;;  %2081 = vtanh.f32 %v1004_v41  ;;  %1337 = vmatprep.subr.mxu0 %v2054_v36  ;;  %v1179_v41 = vld [vmem:[#allocation2 + $0x290] sm:$0xff]  ;;  %v1188_v36 = vld [vmem:[#allocation2 + $0x2d8] sm:$0xff] }
 0x337   :  { %v2058_v33 = vpop.eup %2057  ;;  %2083 = vtanh.f32 %v1002_v11  ;;  %1338 = vmatpush1.msra.mxu0 %v2056_v2  ;;  %v1184_v11 = vld [vmem:[#allocation2 + $0x2b8] sm:$0xff]  ;;  %v1189_v2 = vld [vmem:[#allocation2 + $0x2e0] sm:$0xff] }
 0x338   :  { %v2060_v28 = vpop.eup %2059  ;;  %2085 = vtanh.f32 %v998_v16  ;;  %1339 = vmatprep.subr.mxu0 %v2058_v33  ;;  %v1185_v16 = vld [vmem:[#allocation2 + $0x2c0] sm:$0xff]  ;;  %v1191_v33 = vld [vmem:[#allocation2 + $0x2f0] sm:$0xff] }
 0x339   :  { %v2062_v59 = vpop.eup %2061  ;;  %2087 = vtanh.f32 %v996_v57  ;;  %1340 = vmatpush1.msra.mxu0 %v2060_v28  ;;  %v1190_v57 = vld [vmem:[#allocation2 + $0x2e8] sm:$0xff]  ;;  %v1196_v28 = vld [vmem:[#allocation2 + $0x318] sm:$0xff] }
 0x33a   :  { %v2064_v43 = vpop.eup %2063  ;;  %2089 = vtanh.f32 %v992_v51  ;;  %1341 = vmatprep.subr.mxu0 %v2062_v59  ;;  %v1192_v51 = vld [vmem:[#allocation2 + $0x2f8] sm:$0xff]  ;;  %v1195_v59 = vld [vmem:[#allocation2 + $0x310] sm:$0xff] }
 0x33b   :  { %v2066_v60 = vpop.eup %2065  ;;  %2091 = vtanh.f32 %v990_v58  ;;  %1342 = vmatpush1.msra.mxu0 %v2064_v43  ;;  %v1194_v58 = vld [vmem:[#allocation2 + $0x308] sm:$0xff] }
 0x33c   :  { %v2068_v30 = vpop.eup %2067  ;;  %1343 = vmatprep.subr.mxu0 %v2066_v60  ;;  %2093 = vtanh.f32 %v1076_v62  ;;  %v1198_v43 = vld [vmem:[#allocation2 + $0x328] sm:$0xff]  ;;  %v1197_v60 = vld [vmem:[#allocation2 + $0x320] sm:$0xff]  ;;  %v1203_v62 = vld [vmem:[#allocation2 + $0x350] sm:$0xff] }
 0x33d   :  { %v2070_v61 = vpop.eup %2069  ;;  %1344 = vmatpush1.msra.mxu0 %v2068_v30  ;;  %2095 = vtanh.f32 %v1074_v25  ;;  %v1199_v30 = vld [vmem:[#allocation2 + $0x330] sm:$0xff] }
 0x33e   :  { %v2072_v12 = vpop.eup %2071  ;;  %1345 = vmatprep.subr.mxu0 %v2070_v61  ;;  %2097 = vtanh.f32 %v1070_v8  ;;  %v1202_v61 = vld [vmem:[#allocation2 + $0x348] sm:$0xff] }
 0x33f   :  { %v2074_v63 = vpop.eup %2073  ;;  %1346 = vmatpush1.msra.mxu0 %v2072_v12  ;;  %2099 = vtanh.f32 %v1068_v27  ;;  %v1204_v12 = vld [vmem:[#allocation2 + $0x358] sm:$0xff] }
 0x340   :  { %v2076_v18 = vpop.eup %2075  ;;  %1347 = vmatprep.subr.mxu0 %v2074_v63  ;;  %v1595_v63 = vld [vmem:[%s2785_s3 + $0x8] sm:$0xff] }
 0x341   :  { %v2078_v1 = vpop.eup %2077  ;;  %1348 = vmatpush1.msra.mxu0 %v2076_v18  ;;  %1820 = vmatprep.mubr.msk.f32.mxu1 %vm478_vm0, %v1595_v63 }
 0x342   :  { %v2080_v31 = vpop.eup %2079  ;;  %1349 = vmatprep.subr.mxu0 %v2078_v1 }
 0x343   :  { %v2082_v32 = vpop.eup %2081  ;;  %1350 = vmatpush1.msra.mxu0 %v2080_v31 }
 0x344   :  { %v2084_v34 = vpop.eup %2083  ;;  %1351 = vmatprep.subr.mxu0 %v2082_v32 }
 0x345   :  { %v2086_v38 = vpop.eup %2085  ;;  %1352 = vmatpush1.msra.mxu0 %v2084_v34 }
 0x346   :  { %v2088_v39 = vpop.eup %2087  ;;  %1353 = vmatprep.subr.mxu0 %v2086_v38 }
 0x347   :  { %v2090_v42 = vpop.eup %2089  ;;  %1354 = vmatpush1.msra.mxu0 %v2088_v39 }
 0x348   :  { %v2092_v5 = vpop.eup %2091  ;;  %1355 = vmatprep.subr.mxu0 %v2090_v42 }
 0x349   :  { %1356 = vmatpush1.msra.mxu0 %v2092_v5  ;;  %v2094_v15 = vpop.eup %2093 }
 0x34a   :  { %1357 = vmatprep.subr.mxu0 %v986_v0  ;;  %v2096_v24 = vpop.eup %2095 }
 0x34b   :  { %1358 = vmatpush1.msra.mxu0 %v984_v13  ;;  %v2098_v23 = vpop.eup %2097 }
 0x34c   :  { %1359 = vmatprep.subr.mxu0 %v980_v49  ;;  %v2100_v48 = vpop.eup %2099 }
 0x34d   :  { %1360 = vmatpush1.msra.mxu0 %v978_v50 }
 0x34e   :  { %1361 = vmatprep.subr.mxu0 %v974_v52 }
 0x34f   :  { %1362 = vmatpush1.msra.mxu0 %v972_v14 }
 0x350   :  { %1391 = vmatprep.subr.mxu0 %v2094_v15 }
 0x351   :  { %1392 = vmatpush2.msra.mxu0 %v2096_v24 }
 0x352   :  { %1393 = vmatprep.subr.mxu0 %v2098_v23 }
 0x353   :  { %1394 = vmatpush2.msra.mxu0 %v2100_v48 }
 0x354   :  { %1396 = vmatmul.mubr.f32.vlgmr.msra.gmra.mxu0 %v1169_v53  ;;  %v1267_v53 = vpop.permute.xlu1 %1266 }
 0x355   :  { %1803 = vmatprep.mubr.msk.f32.mxu0 %vm478_vm0, %v1172_v3 }
 0x358   :  { %1402 = vmatmul.mubr.f32.gmra.mxu0 %v1171_v17 }
 0x359   :  { %1804 = vmatprep.mubr.msk.f32.mxu0 %vm478_vm0, %v1174_v21  ;;  %v1259_v21 = vpop.permute.xlu1 %1258 }
 0x35c   :  { %1408 = vmatmul.mubr.f32.gmra.mxu0 %v1173_v6 }
 0x35d   :  { %1805 = vmatprep.mubr.msk.f32.mxu0 %vm478_vm0, %v1176_v47 }
 0x360   :  { %1414 = vmatmul.mubr.f32.gmra.mxu0 %v1175_v44  ;;  %v1263_v44 = vpop.permute.xlu0 %1262 }
 0x361   :  { %1806 = vmatprep.mubr.msk.f32.mxu0 %vm478_vm0, %v1178_v7 }
 0x364   :  { %1420 = vmatmul.mubr.f32.gmra.mxu0 %v1177_v55  ;;  %v1255_v55 = vpop.permute.xlu1 %1254 }
 0x365   :  { %1807 = vmatprep.mubr.msk.f32.mxu0 %vm478_vm0, %v1180_v4 }
 0x368   :  { %1426 = vmatmul.mubr.f32.gmra.mxu0 %v1179_v41 }
 0x369   :  { %1808 = vmatprep.mubr.msk.f32.mxu0 %vm478_vm0, %v1182_v54 }
 0x36c   :  { %1432 = vmatmul.mubr.f32.gmra.mxu0 %v1181_v40 }
 0x36d   :  { %1809 = vmatprep.mubr.msk.f32.mxu0 %vm478_vm0, %v1184_v11 }
 0x370   :  { %1438 = vmatmul.mubr.f32.gmra.mxu0 %v1183_v56 }
 0x371   :  { %1810 = vmatprep.mubr.msk.f32.mxu0 %vm478_vm0, %v1186_v37  ;;  %v1251_v37 = vpop.permute.xlu0 %1250 }
 0x374   :  { %1444 = vmatmul.mubr.f32.gmra.mxu0 %v1185_v16 }
 0x375   :  { %1811 = vmatprep.mubr.msk.f32.mxu0 %vm478_vm0, %v1188_v36 }
 0x378   :  { %1450 = vmatmul.mubr.f32.gmra.mxu0 %v1187_v19  ;;  %v1247_v19 = vpop.permute.xlu1 %1246 }
 0x379   :  { %1812 = vmatprep.mubr.msk.f32.mxu0 %vm478_vm0, %v1190_v57 }
 0x37c   :  { %1456 = vmatmul.mubr.f32.gmra.mxu0 %v1189_v2 }
 0x37d   :  { %1813 = vmatprep.mubr.msk.f32.mxu0 %vm478_vm0, %v1192_v51 }
 0x380   :  { %1462 = vmatmul.mubr.f32.gmra.mxu0 %v1191_v33 }
 0x381   :  { %1814 = vmatprep.mubr.msk.f32.mxu0 %vm478_vm0, %v1194_v58  ;;  %v1243_v58 = vpop.permute.xlu0 %1242 }
 0x384   :  { %1468 = vmatmul.mubr.f32.gmra.mxu0 %v1193_v9 }
 0x385   :  { %1815 = vmatprep.mubr.msk.f32.mxu0 %vm478_vm0, %v1196_v28 }
 0x388   :  { %1474 = vmatmul.mubr.f32.gmra.mxu0 %v1195_v59  ;;  %v1239_v59 = vpop.permute.xlu1 %1238 }
 0x389   :  { %1816 = vmatprep.mubr.msk.f32.mxu0 %vm478_vm0, %v1198_v43 }
 0x38c   :  { %1480 = vmatmul.mubr.f32.gmra.mxu0 %v1197_v60 }
 0x38d   :  { %1817 = vmatprep.mubr.msk.f32.mxu0 %vm478_vm0, %v1200_v26 }
 0x390   :  { %1486 = vmatmul.mubr.f32.gmra.mxu0 %v1199_v30 }
 0x391   :  { %1818 = vmatprep.mubr.msk.f32.mxu0 %vm478_vm0, %v1202_v61 }
 0x394   :  { %1492 = vmatmul.mubr.f32.gmra.mxu0 %v1201_v45 }
 0x395   :  { %1819 = vmatprep.mubr.msk.f32.mxu0 %vm478_vm0, %v1204_v12  ;;  %v1235_v12 = vpop.permute.xlu0 %1234 }
 0x398   :  { %1498 = vmatmul.mubr.f32.gmra.mxu0 %v1203_v62 }
 0x414   :  { %v2726_v46 = vpop.f32.mrf.mxu0 }
 0x416   :  { %v2728_v25 = vpop.f32.mrf.mxu0 }
 0x418   :  { %v2730_v18 = vpop.f32.mrf.mxu0 }
 0x41a   :  { %v2732_v8 = vpop.f32.mrf.mxu0 }
 0x41c   :  { %v2734_v1 = vpop.f32.mrf.mxu0 }
 0x41e   :  { %v2736_v27 = vpop.f32.mrf.mxu0 }
 0x420   :  { %v2738_v31 = vpop.f32.mrf.mxu0 }
 0x422   :  { %v2740_v32 = vpop.f32.mrf.mxu0 }
 0x424   :  { %v2742_v34 = vpop.f32.mrf.mxu0 }
 0x426   :  { %v2744_v35 = vpop.f32.mrf.mxu0 }
 0x428   :  { %v2746_v38 = vpop.f32.mrf.mxu0 }
 0x42a   :  { %v2748_v39 = vpop.f32.mrf.mxu0 }
 0x42c   :  { %v2750_v42 = vpop.f32.mrf.mxu0 }
 0x42e   :  { %v2752_v5 = vpop.f32.mrf.mxu0 }
 0x430   :  { %v2754_v10 = vpop.f32.mrf.mxu0 }
 0x432   :  { %v2756_v0 = vpop.f32.mrf.mxu0 }
 0x434   :  { %v1445_v13 = vpop.f32.mrf.mxu0 }
 0x435   :  { %v1446_v26 = vadd.f32 %v1445_v13, %v1239_v59 }
 0x436   :  { %v1447_v29 = vpop.f32.mrf.mxu0 }
 0x437   :  { %v1448_v60 = vadd.f32 %v1447_v29, %v1239_v59  ;;  %v1699_v59 = vstv %s1824_s26 }
 0x438   :  { %v1451_v49 = vpop.f32.mrf.mxu0 }
 0x439   :  { %v1452_v43 = vadd.f32 %v1451_v49, %v1243_v58 }
 0x43a   :  { %v1453_v50 = vpop.f32.mrf.mxu0 }
 0x43b   :  { %v1454_v28 = vadd.f32 %v1453_v50, %v1243_v58  ;;  %v1231_v50 = vpop.permute.xlu1 %1230 }
 0x43c   :  { %v1457_v52 = vpop.f32.mrf.mxu0 }
 0x43d   :  { %v1458_v9 = vadd.f32 %v1457_v52, %v1247_v19 }
 0x43e   :  { %v1459_v14 = vpop.f32.mrf.mxu0 }
 0x43f   :  { %v1460_v33 = vadd.f32 %v1459_v14, %v1247_v19 }
 0x440   :  { %v1463_v15 = vpop.f32.mrf.mxu0 }
 0x441   :  { %v1464_v51 = vadd.f32 %v1463_v15, %v1251_v37  ;;  %v1275_v15 = vpop.permute.xlu0 %1274 }
 0x442   :  { %v1465_v24 = vpop.f32.mrf.mxu0 }
 0x443   :  { %v1466_v2 = vadd.f32 %v1465_v24, %v1251_v37 }
 0x444   :  { %v1469_v23 = vpop.f32.mrf.mxu0 }
 0x445   :  { %v1470_v57 = vadd.f32 %v1469_v23, %v1255_v55 }
 0x446   :  { %v1471_v48 = vpop.f32.mrf.mxu0 }
 0x447   :  { %v1472_v36 = vadd.f32 %v1471_v48, %v1255_v55  ;;  %v1227_v48 = vpop.permute.xlu1 %1226 }
 0x448   :  { %v1475_v3 = vpop.f32.mrf.mxu0 }
 0x449   :  { %v1476_v16 = vadd.f32 %v1475_v3, %v1259_v21 }
 0x44a   :  { %v1477_v17 = vpop.f32.mrf.mxu0 }
 0x44b   :  { %v1478_v56 = vadd.f32 %v1477_v17, %v1259_v21 }
 0x44c   :  { %v1481_v6 = vpop.f32.mrf.mxu0 }
 0x44d   :  { %v1482_v11 = vadd.f32 %v1481_v6, %v1263_v44 }
 0x44e   :  { %v1483_v47 = vpop.f32.mrf.mxu0 }
 0x44f   :  { %v1484_v54 = vadd.f32 %v1483_v47, %v1263_v44  ;;  %v1271_v44 = vpop.permute.xlu0 %1270 }
 0x450   :  { %v1487_v7 = vpop.f32.mrf.mxu0 }
 0x451   :  { %v1488_v4 = vadd.f32 %v1487_v7, %v1267_v53 }
 0x452   :  { %v1489_v41 = vpop.f32.mrf.mxu0 }
 0x453   :  { %v1490_v40 = vadd.f32 %v1489_v41, %v1267_v53  ;;  %v1442_v41 = vadd.f32 %v2756_v0, %v1235_v12  ;;  %v1219_v19 = vpop.permute.xlu0 %1218  ;;  %v1428_v0 = vadd.f32 %v2746_v38, %v1227_v48 }
 0x454   :  { %v1493_v61 = vpop.f32.mrf.mxu0 }
 0x455   :  { %2101 = vtanh.f32 %v1490_v40  ;;  %v1440_v40 = vadd.f32 %v2754_v10, %v1235_v12 }
 0x456   :  { %2103 = vtanh.f32 %v1488_v4  ;;  %v1495_v52 = vpop.f32.mrf.mxu0  ;;  %v1223_v4 = vpop.permute.xlu1 %1222 }
 0x457   :  { %2105 = vtanh.f32 %v1484_v54  ;;  %v1496_v37 = vadd.f32 %v1495_v52, %v1271_v44 }
 0x458   :  { %2107 = vtanh.f32 %v1482_v11  ;;  %v1499_v23 = vpop.f32.mrf.mxu0 }
 0x459   :  { %2109 = vtanh.f32 %v1478_v56  ;;  %v1500_v11 = vadd.f32 %v1499_v23, %v1275_v15  ;;  %v1436_v56 = vadd.f32 %v2752_v5, %v1231_v50  ;;  %v1422_v5 = vadd.f32 %v2742_v34, %v1223_v4 }
 0x45a   :  { %2111 = vtanh.f32 %v1476_v16  ;;  %v1501_v6 = vpop.f32.mrf.mxu0  ;;  %v1434_v16 = vadd.f32 %v2750_v42, %v1231_v50  ;;  %v1215_v10 = vpop.permute.xlu1 %1214  ;;  %v1418_v42 = vadd.f32 %v2740_v32, %v1219_v19 }
 0x45b   :  { %2113 = vtanh.f32 %v1472_v36  ;;  %v1502_v54 = vadd.f32 %v1501_v6, %v1275_v15  ;;  %v1494_v36 = vadd.f32 %v1493_v61, %v1271_v44  ;;  %v1412_v38 = vadd.f32 %v2736_v27, %v1215_v10 }
 0x45c   :  { %2115 = vtanh.f32 %v1470_v57  ;;  %v1430_v57 = vadd.f32 %v2748_v39, %v1227_v48  ;;  %v1416_v39 = vadd.f32 %v2738_v31, %v1219_v19 }
 0x45d   :  { %2117 = vtanh.f32 %v1466_v2  ;;  %v1424_v2 = vadd.f32 %v2744_v35, %v1223_v4  ;;  %v1717_v4 = vstv %s1826_s4 }
 0x45e   :  { %2119 = vtanh.f32 %v1464_v51  ;;  %v1211_v51 = vpop.permute.xlu0 %1210  ;;  %v1207_v35 = vpop.permute.xlu1 %1206 }
 0x45f   :  { %2121 = vtanh.f32 %v1460_v33  ;;  %v1410_v33 = vadd.f32 %v2734_v1, %v1215_v10  ;;  %v1406_v58 = vadd.f32 %v2732_v8, %v1211_v51  ;;  %v1404_v34 = vadd.f32 %v2730_v18, %v1211_v51  ;;  %v1594_v8 = vld [vmem:[%s2785_s3] sm:$0xff]  ;;  %s1823_s3 = sld [smem:[#allocation6 + $0x4]] }
 0x460   :  { %2123 = vtanh.f32 %v1458_v9  ;;  %v1400_v32 = vadd.f32 %v2728_v25, %v1207_v35  ;;  %v1398_v31 = vadd.f32 %v2726_v46, %v1207_v35  ;;  %v1671_v46 = vstv %s1670_s24 }
 0x461   :  { %2125 = vtanh.f32 %v1454_v28  ;;  %v1681_v25 = vstv %s1822_s25 }
 0x462   :  { %v2102_v30 = vpop.eup %2101  ;;  %2127 = vtanh.f32 %v1452_v43 }
 0x463   :  { %v2104_v45 = vpop.eup %2103  ;;  %2129 = vtanh.f32 %v1448_v60  ;;  %1599 = vmatprep.subr.mxu1 %v2102_v30 }
 0x464   :  { %v2106_v62 = vpop.eup %2105  ;;  %2131 = vtanh.f32 %v1446_v26  ;;  %1600 = vmatpush1.msra.mxu1 %v2104_v45 }
 0x465   :  { %v2108_v63 = vpop.eup %2107  ;;  %1601 = vmatprep.subr.mxu1 %v2106_v62  ;;  %2133 = vtanh.f32 %v1502_v54  ;;  %v1687_v62 = vstv %s1823_s3 }
 0x466   :  { %v2110_v49 = vpop.eup %2109  ;;  %1602 = vmatpush1.msra.mxu1 %v2108_v63  ;;  %2135 = vtanh.f32 %v1500_v11 }
 0x467   :  { %v2112_v29 = vpop.eup %2111  ;;  %1603 = vmatprep.subr.mxu1 %v2110_v49  ;;  %2137 = vtanh.f32 %v1496_v37  ;;  %v1677_v49 = vstv %s1821_s27 }
 0x468   :  { %v2114_v13 = vpop.eup %2113  ;;  %1604 = vmatpush1.msra.mxu1 %v2112_v29  ;;  %2139 = vtanh.f32 %v1494_v36 }
 0x469   :  { %v2116_v14 = vpop.eup %2115  ;;  %1605 = vmatprep.subr.mxu1 %v2114_v13  ;;  %v1705_v13 = vstv %s1825_s28 }
 0x46a   :  { %v2118_v24 = vpop.eup %2117  ;;  %1606 = vmatpush1.msra.mxu1 %v2116_v14 }
 0x46b   :  { %v2120_v53 = vpop.eup %2119  ;;  %1607 = vmatprep.subr.mxu1 %v2118_v24 }
 0x46c   :  { %v2122_v3 = vpop.eup %2121  ;;  %1608 = vmatpush1.msra.mxu1 %v2120_v53 }
 0x46d   :  { %v2124_v17 = vpop.eup %2123  ;;  %1609 = vmatprep.subr.mxu1 %v2122_v3 }
 0x46e   :  { %v2126_v21 = vpop.eup %2125  ;;  %1610 = vmatpush1.msra.mxu1 %v2124_v17 }
 0x46f   :  { %v2128_v47 = vpop.eup %2127  ;;  %1611 = vmatprep.subr.mxu1 %v2126_v21 }
 0x470   :  { %v2130_v7 = vpop.eup %2129  ;;  %1612 = vmatpush1.msra.mxu1 %v2128_v47 }
 0x471   :  { %v2132_v55 = vpop.eup %2131  ;;  %1613 = vmatprep.subr.mxu1 %v2130_v7 }
 0x472   :  { %1614 = vmatpush1.msra.mxu1 %v2132_v55  ;;  %v2134_v9 = vpop.eup %2133 }
 0x473   :  { %1615 = vmatprep.subr.mxu1 %v1442_v41  ;;  %v2136_v27 = vpop.eup %2135 }
 0x474   :  { %1616 = vmatpush1.msra.mxu1 %v1440_v40  ;;  %v2138_v1 = vpop.eup %2137 }
 0x475   :  { %1617 = vmatprep.subr.mxu1 %v1436_v56  ;;  %v2140_v28 = vpop.eup %2139  ;;  %v2242_v56 = vmov 1966171168  }
 0x476   :  { %1618 = vmatpush1.msra.mxu1 %v1434_v16  ;;  %v1730_v37 = vunpack.c.l.s4 %v2242_v56 }
 0x477   :  { %1619 = vmatprep.subr.mxu1 %v1430_v57 }
 0x478   :  { %1620 = vmatpush1.msra.mxu1 %v1428_v0  ;;  %v1731_v36 = vunpack.c.0.s8 %v1730_v37 }
 0x479   :  { %1621 = vmatprep.subr.mxu1 %v1424_v2 }
 0x47a   :  { %1622 = vmatpush1.msra.mxu1 %v1422_v5  ;;  %v1734_v5 = vsub.s32 %v1731_v36, %v2427_v22 }
 0x47b   :  { %1623 = vmatprep.subr.mxu1 %v1418_v42 }
 0x47c   :  { %1624 = vmatpush1.msra.mxu1 %v1416_v39 }
 0x47d   :  { %1625 = vmatprep.subr.mxu1 %v1412_v38 }
 0x47e   :  { %1626 = vmatpush1.msra.mxu1 %v1410_v33 }
 0x47f   :  { %1627 = vmatprep.subr.mxu1 %v1406_v58 }
 0x480   :  { %1628 = vmatpush1.msra.mxu1 %v1404_v34 }
 0x481   :  { %1629 = vmatprep.subr.mxu1 %v1400_v32 }
 0x482   :  { %1630 = vmatpush1.msra.mxu1 %v1398_v31 }
 0x483   :  { %1659 = vmatprep.subr.mxu1 %v2134_v9 }
 0x484   :  { %1660 = vmatpush2.msra.mxu1 %v2136_v27 }
 0x485   :  { %1661 = vmatprep.subr.mxu1 %v2138_v1 }
 0x486   :  { %1662 = vmatpush2.msra.mxu1 %v2140_v28 }
 0x487   :  { %1664 = vmatmul.mubr.f32.vlgmr.msra.gmra.mxu1 %v1594_v8 }
 0x547   :  { %v1665_v18 = vpop.f32.mrf.mxu1 }
 0x548   :  { %v1672_v43 = vadd.f32 %v1671_v46, %v1665_v18  ;;  %v1682_v60 = vadd.f32 %v1681_v25, %v1665_v18  ;;  %v1700_v45 = vadd.f32 %v1699_v59, %v1665_v18 }
 0x549   :  { %v1667_v26 = vpop.f32.mrf.mxu1 }
 0x54a   :  { %v1673_v30 = vadd.f32 %v1671_v46, %v1667_v26  ;;  %2141 = vtanh.f32 %v1672_v43  ;;  %v1683_v61 = vadd.f32 %v1681_v25, %v1667_v26  ;;  %v1701_v12 = vadd.f32 %v1699_v59, %v1667_v26 }
 0x54b   :  { %2143 = vtanh.f32 %v1682_v60 }
 0x54c   :  { %2145 = vtanh.f32 %v1673_v30 }
 0x54d   :  { %2147 = vtanh.f32 %v1683_v61 }
 0x54e   :  { %2149 = vtanh.f32 %v1700_v45 }
 0x54f   :  { %2151 = vtanh.f32 %v1701_v12 }
 0x557   :  { %v2142_v63 = vpop.eup %2141 }
 0x558   :  { %v2144_v50 = vpop.eup %2143  ;;  %v1678_v24 = vmul.f32 %v2142_v63, %v1677_v49 }
 0x559   :  { %v2146_v52 = vpop.eup %2145  ;;  %v1688_v29 = vmul.f32 %v2144_v50, %v1687_v62 }
 0x55a   :  { %v2148_v14 = vpop.eup %2147  ;;  %v1679_v17 = vmul.f32 %v2146_v52, %v1677_v49 }
 0x55b   :  { %v2150_v15 = vpop.eup %2149  ;;  %v1689_v23 = vmul.f32 %v2148_v14, %v1687_v62  ;;  %v1692_v53 = vrot.slane %v1688_v29, 1 }
 0x55c   :  { %v2152_v48 = vpop.eup %2151  ;;  %v1706_v3 = vmul.f32 %v2150_v15, %v1705_v13 }
 0x55d   :  { %v1693_v21 = vrot.slane %v1689_v23, 1  ;;  %v1707_v6 = vmul.f32 %v2152_v48, %v1705_v13  ;;  %v1696_v47 = vadd.f32 %v1692_v53, %v1678_v24 }
 0x55e   :  { %v1710_v44 = vrot.slane %v1706_v3, 2 }
 0x55f   :  { %v1711_v7 = vrot.slane %v1707_v6, 2  ;;  %v1697_v55 = vadd.f32 %v1693_v21, %v1679_v17 }
 0x560   :  { %v1714_v41 = vadd.f32 %v1710_v44, %v1696_v47 }
 0x561   :  { %v1715_v54 = vadd.f32 %v1711_v7, %v1697_v55 }
 0x562   :  { %v1718_v40 = vadd.f32 %v1717_v4, %v1714_v41 }
 0x563   :  { %v1719_v11 = vadd.f32 %v1717_v4, %v1715_v54 }
 0x564   :  { %2153 = vtanh.f32 %v1718_v40 }
 0x565   :  { %2155 = vtanh.f32 %v1719_v11 }
 0x571   :  { %v2154_v16 = vpop.eup %2153 }
 0x572   :  { %v2156_v19 = vpop.eup %2155  ;;  %v1722_v57 = vmul.f32 0.5, %v2154_v16 }
 0x573   :  { %v1723_v0 = vmul.f32 0.5, %v2156_v19 }
 0x574   :  { %v1724_v10 = vadd.f32 1.5, %v1722_v57 }
 0x575   :  { %v1725_v2 = vadd.f32 1.5, %v1723_v0 }
 0x577   :  { %v1728_v42 = vcombine.low %v1724_v10, %v1725_v2 }
 0x579   :  { %v1735_v39 = vrot.slane %v1728_v42, %v1734_v5 }
 0x57b   :  { %v1742_v51 = vrot.slane %v1735_v39, %v1734_v5 }
 0x57d   :  { %1748 = vst.msk [vmem:[#allocation7] sm:$0x3] %vm1746_vm1, %v1742_v51 }
 0x57e   :  { %2218 = shalt.err (!%p2215_p0)
}
 0x57f   :  { %1758 = dma.vmem_to_hbm [thread:$0]  %s1756_s30, 32, %s2787_s5, [#allocation4]  }
 0x580   :  { %2231 = dma.done.wait [#allocation4], 32  }
 0x581   :  { %2232 = vsyncadd [#allocation4], 4294967264 }
 0x582   :  { %1762 = vsyncpa [#allocation3], 1 }
 0x583   :  { %1763 = vsyncpa [#allocation4], 1 }
 0x584   :  { %1764 = vsyncpa [#allocation5], 1 }

</bundles_post_ra>
